<compile_context>
chip_gen: v7x
topology: tpu7x:2x2x1
jax: 0.10.0
libtpu: 0.0.40
codegen_flags: <defaults>
</compile_context>

<pallas_src>
import math

import jax
import jax.numpy as jnp
from jax.experimental import pallas as pl
from jax.experimental.pallas import tpu as pltpu


# ----------------------------- kernels ------------------------------------ #

def _matmul_kernel(a_ref, b_ref, o_ref, acc_ref):
    """o = a @ b, tiled over (m, n, k) with an f32 VMEM accumulator."""
    @pl.when(pl.program_id(2) == 0)
    def _init():
        acc_ref[...] = jnp.zeros_like(acc_ref)

    acc_ref[...] += jnp.dot(a_ref[...], b_ref[...],
                            preferred_element_type=jnp.float32)

    @pl.when(pl.program_id(2) == pl.num_programs(2) - 1)
    def _finalize():
        o_ref[...] = acc_ref[...].astype(o_ref.dtype)


def _gated_matmul_kernel(a_ref, b_ref, gate_ref, o_ref, acc_ref):
    """o = silu(gate) * (a @ b); the SwiGLU gate is fused into finalize."""
    @pl.when(pl.program_id(2) == 0)
    def _init():
        acc_ref[...] = jnp.zeros_like(acc_ref)

    acc_ref[...] += jnp.dot(a_ref[...], b_ref[...],
                            preferred_element_type=jnp.float32)

    @pl.when(pl.program_id(2) == pl.num_programs(2) - 1)
    def _finalize():
        g = gate_ref[...].astype(jnp.float32)
        # silu(g) = g * sigmoid(g); computed in f32 on the VPU/EUP.
        sig = 1.0 / (1.0 + jnp.exp(-g))
        o_ref[...] = (g * sig * acc_ref[...]).astype(o_ref.dtype)


# ----------------------------- wrappers ------------------------------------ #

def _fit_tile(dim, pref):
    # Preferred tile if it divides the dim, else the full extent (always legal).
    return pref if dim % pref == 0 else dim


def _tiled_matmul(a, b, gate=None, *, out_dtype, tm=128, tn=128, tk=128,
                  vmem_limit_bytes=32 * 1024 * 1024):
    """Tiled (m, n, k) matmul; if `gate` is given, fuse silu(gate)*result."""
    M, K = a.shape
    K2, N = b.shape
    assert K == K2, (a.shape, b.shape)
    tm, tn, tk = _fit_tile(M, tm), _fit_tile(N, tn), _fit_tile(K, tk)
    grid = (M // tm, N // tn, K // tk)

    in_specs = [
        pl.BlockSpec((tm, tk), lambda i, j, k: (i, k)),   # activations tile
        pl.BlockSpec((tk, tn), lambda i, j, k: (k, j)),   # streamed weight tile
    ]
    operands = [a, b]
    kernel = _matmul_kernel
    if gate is not None:
        # Gate block is k-invariant -> fetched once per (i, j) by the pipeliner.
        in_specs.append(pl.BlockSpec((tm, tn), lambda i, j, k: (i, j)))
        operands.append(gate)
        kernel = _gated_matmul_kernel

    return pl.pallas_call(
        kernel,
        out_shape=jax.ShapeDtypeStruct((M, N), out_dtype),
        grid_spec=pltpu.PrefetchScalarGridSpec(
            num_scalar_prefetch=0,
            grid=grid,
            in_specs=in_specs,
            out_specs=pl.BlockSpec((tm, tn), lambda i, j, k: (i, j)),
            scratch_shapes=[pltpu.VMEM((tm, tn), jnp.float32)],
        ),
        compiler_params=pltpu.CompilerParams(
            dimension_semantics=("parallel", "parallel", "arbitrary"),
            vmem_limit_bytes=vmem_limit_bytes,
        ),
    )(*operands)


def feed_forward(x, params, *, tm=128, tn=128, tk=128):
    """x: (B, T, emb_dim) f32.  params: {'w1','w2','w3'} pre-transposed (in, out).

    At real Llama scale, raise tm/tn/tk (e.g. 256-512) for better pipelining;
    weight VMEM residency stays O(tk*tn) regardless of model width.
    """
    B, T, E = x.shape
    H = params["w1"].shape[1]
    assert params["w1"].shape == (E, H)
    # The reference forward applies fc2 to x1, which requires emb_dim == hidden_dim.
    assert params["w2"].shape == (E, H)
    assert E == H, "FeedForward.forward (fc2 applied to x1) requires emb_dim == hidden_dim"
    assert params["w3"].shape == (H, E)

    compute_dtype = jnp.bfloat16          # MXU inputs; f32 accumulation in-kernel
    xf = x.reshape(B * T, E).astype(compute_dtype)
    w1 = params["w1"].astype(compute_dtype)
    w2 = params["w2"].astype(compute_dtype)
    w3 = params["w3"].astype(compute_dtype)

    tiles = dict(tm=tm, tn=tn, tk=tk)
    x1 = _tiled_matmul(xf, w1, out_dtype=compute_dtype, **tiles)        # fc1
    g = _tiled_matmul(x1, w2, gate=x1, out_dtype=compute_dtype, **tiles)  # silu(x1)*fc2(x1)
    y = _tiled_matmul(g, w3, out_dtype=x.dtype, **tiles)                # fc3
    return y.reshape(B, T, E)


# ----------------------------- reference / demo ---------------------------- #

def _reference(x, params):
    """Pure-JAX f32 mirror of the PyTorch forward."""
    x1 = x @ params["w1"]
    x2 = x1 @ params["w2"]           # fc2 applied to x1, exactly as in the module
    return (x1 * jax.nn.sigmoid(x1) * x2) @ params["w3"]


if __name__ == "__main__":
    # Small, TPU-aligned config; emb_dim == hidden_dim as the reference forward requires.
    B, T, E, H = 2, 128, 256, 256

    key = jax.random.PRNGKey(0)
    kx, k1, k2, k3 = jax.random.split(key, 4)

    x = jax.random.normal(kx, (B, T, E), dtype=jnp.float32)

    # nn.Linear-style uniform init, stored pre-transposed as (in, out).
    def init_w(k, fan_in, fan_out):
        bound = 1.0 / math.sqrt(fan_in)
        return jax.random.uniform(k, (fan_in, fan_out), jnp.float32, -bound, bound)

    params = {
        "w1": init_w(k1, E, H),
        "w2": init_w(k2, E, H),
        "w3": init_w(k3, H, E),
    }

    ffn = jax.jit(feed_forward)
    out = jax.block_until_ready(ffn(x, params))

    ref = _reference(x, params)
    assert out.shape == (B, T, E)
    assert out.dtype == x.dtype
    # bf16 MXU inputs with f32 accumulation -> relaxed tolerance vs f32 reference.
    assert jnp.allclose(out, ref, atol=2e-2, rtol=2e-2), (
        "mismatch vs reference: max abs err "
        f"{float(jnp.max(jnp.abs(out - ref)))}")

    print("KERNEL_OK")
</pallas_src>

<mosaic_0001>
module attributes {stable_mosaic.version = 11 : i64} {
  func.func @_gated_matmul_kernel(%arg0: i32, %arg1: i32, %arg2: i32, %arg3: memref<128x128xbf16, #tpu.memory_space<vmem>>, %arg4: memref<128x128xbf16, #tpu.memory_space<vmem>>, %arg5: memref<128x128xbf16, #tpu.memory_space<vmem>>, %arg6: memref<128x128xbf16, #tpu.memory_space<vmem>>, %arg7: memref<128x128xf32, #tpu.memory_space<vmem>>) attributes {dimension_semantics = [#tpu.dimension_semantics<parallel>, #tpu.dimension_semantics<parallel>, #tpu.dimension_semantics<arbitrary>], iteration_bounds = array<i64: 2, 2, 2>, scalar_prefetch = 0 : i64, scratch_operands = 1 : i64, tpu.core_type = #tpu.core_type<tc>, window_params = [{transform_indices = @transform_0, window_bounds = array<i64: 128, 128>}, {transform_indices = @transform_1, window_bounds = array<i64: 128, 128>}, {transform_indices = @transform_2, window_bounds = array<i64: 128, 128>}, {transform_indices = @transform_3, window_bounds = array<i64: 128, 128>}]} {
    %c0_i32 = arith.constant 0 : i32
    %0 = arith.cmpi eq, %arg2, %c0_i32 : i32
    %1 = arith.extui %0 : i1 to i32
    %c0_i32_0 = arith.constant 0 : i32
    %2 = arith.cmpi ne, %1, %c0_i32_0 : i32
    scf.if %2 {
      %cst_9 = arith.constant 0.000000e+00 : f32
      %12 = vector.broadcast %cst_9 : f32 to vector<128x128xf32>
      %c0_10 = arith.constant 0 : index
      %c0_11 = arith.constant 0 : index
      %13 = vector.load %arg7[%c0_10, %c0_11] : memref<128x128xf32, #tpu.memory_space<vmem>>, vector<128x128xf32>
      tpu.vector_store %arg7[%c0_10, %c0_11], %12 {strides = array<i32>} : memref<128x128xf32, #tpu.memory_space<vmem>>, vector<128x128xf32>,
    } else {
    }
    %c0 = arith.constant 0 : index
    %c0_1 = arith.constant 0 : index
    %3 = vector.load %arg7[%c0, %c0_1] : memref<128x128xf32, #tpu.memory_space<vmem>>, vector<128x128xf32>
    %c0_2 = arith.constant 0 : index
    %c0_3 = arith.constant 0 : index
    %4 = vector.load %arg3[%c0_2, %c0_3] : memref<128x128xbf16, #tpu.memory_space<vmem>>, vector<128x128xbf16>
    %c0_4 = arith.constant 0 : index
    %c0_5 = arith.constant 0 : index
    %5 = vector.load %arg4[%c0_4, %c0_5] : memref<128x128xbf16, #tpu.memory_space<vmem>>, vector<128x128xbf16>
    %cst = arith.constant dense<0.000000e+00> : vector<128x128xf32>
    %6 = tpu.matmul %4, %5, %cst {dimension_numbers = #tpu.dot_dimension_numbers<[1], [0], [0], [1], [0, 0, 1, 1], [], []>} : vector<128x128xbf16>, vector<128x128xbf16>, vector<128x128xf32> -> vector<128x128xf32>
    %7 = arith.addf %3, %6 : vector<128x128xf32>
    %c0_6 = arith.constant 0 : index
    %c0_7 = arith.constant 0 : index
    %8 = vector.load %arg7[%c0_6, %c0_7] : memref<128x128xf32, #tpu.memory_space<vmem>>, vector<128x128xf32>
    tpu.vector_store %arg7[%c0_6, %c0_7], %7 {strides = array<i32>} : memref<128x128xf32, #tpu.memory_space<vmem>>, vector<128x128xf32>,
    %c1_i32 = arith.constant 1 : i32
    %9 = arith.cmpi eq, %arg2, %c1_i32 : i32
    %10 = arith.extui %9 : i1 to i32
    %c0_i32_8 = arith.constant 0 : i32
    %11 = arith.cmpi ne, %10, %c0_i32_8 : i32
    scf.if %11 {
      %c0_9 = arith.constant 0 : index
      %c0_10 = arith.constant 0 : index
      %12 = vector.load %arg5[%c0_9, %c0_10] : memref<128x128xbf16, #tpu.memory_space<vmem>>, vector<128x128xbf16>
      %13 = arith.extf %12 : vector<128x128xbf16> to vector<128x128xf32>
      %cst_11 = arith.constant 0.000000e+00 : f32
      %14 = vector.broadcast %cst_11 : f32 to vector<128x128xf32>
      %15 = arith.subf %14, %13 : vector<128x128xf32>
      %16 = math.exp %15 : vector<128x128xf32>
      %cst_12 = arith.constant 1.000000e+00 : f32
      %17 = vector.broadcast %cst_12 : f32 to vector<128x128xf32>
      %18 = arith.addf %17, %16 : vector<128x128xf32>
      %cst_13 = arith.constant 1.000000e+00 : f32
      %19 = vector.broadcast %cst_13 : f32 to vector<128x128xf32>
      %20 = arith.divf %19, %18 : vector<128x128xf32>
      %21 = arith.mulf %13, %20 : vector<128x128xf32>
      %c0_14 = arith.constant 0 : index
      %c0_15 = arith.constant 0 : index
      %22 = vector.load %arg7[%c0_14, %c0_15] : memref<128x128xf32, #tpu.memory_space<vmem>>, vector<128x128xf32>
      %23 = arith.mulf %21, %22 : vector<128x128xf32>
      %24 = arith.truncf %23 : vector<128x128xf32> to vector<128x128xbf16>
      %c0_16 = arith.constant 0 : index
      %c0_17 = arith.constant 0 : index
      %25 = vector.load %arg6[%c0_16, %c0_17] : memref<128x128xbf16, #tpu.memory_space<vmem>>, vector<128x128xbf16>
      tpu.vector_store %arg6[%c0_16, %c0_17], %24 {strides = array<i32>} : memref<128x128xbf16, #tpu.memory_space<vmem>>, vector<128x128xbf16>,
    } else {
    }
    return
  }
  func.func @transform_0(%arg0: i32, %arg1: i32, %arg2: i32) -> (i32, i32) {
    %c0_i32 = arith.constant 0 : i32
    return %arg0, %arg2 : i32, i32
  }
  func.func @transform_1(%arg0: i32, %arg1: i32, %arg2: i32) -> (i32, i32) {
    %c0_i32 = arith.constant 0 : i32
    return %arg2, %arg1 : i32, i32
  }
  func.func @transform_2(%arg0: i32, %arg1: i32, %arg2: i32) -> (i32, i32) {
    %c0_i32 = arith.constant 0 : i32
    return %arg0, %arg1 : i32, i32
  }
  func.func @transform_3(%arg0: i32, %arg1: i32, %arg2: i32) -> (i32, i32) {
    %c0_i32 = arith.constant 0 : i32
    return %arg0, %arg1 : i32, i32
  }
}

module attributes {stable_mosaic.version = 11 : i64} {
  func.func @_matmul_kernel(%arg0: i32, %arg1: i32, %arg2: i32, %arg3: memref<128x128xbf16, #tpu.memory_space<vmem>>, %arg4: memref<128x128xbf16, #tpu.memory_space<vmem>>, %arg5: memref<128x128xbf16, #tpu.memory_space<vmem>>, %arg6: memref<128x128xf32, #tpu.memory_space<vmem>>) attributes {dimension_semantics = [#tpu.dimension_semantics<parallel>, #tpu.dimension_semantics<parallel>, #tpu.dimension_semantics<arbitrary>], iteration_bounds = array<i64: 2, 2, 2>, scalar_prefetch = 0 : i64, scratch_operands = 1 : i64, tpu.core_type = #tpu.core_type<tc>, window_params = [{transform_indices = @transform_0, window_bounds = array<i64: 128, 128>}, {transform_indices = @transform_1, window_bounds = array<i64: 128, 128>}, {transform_indices = @transform_2, window_bounds = array<i64: 128, 128>}]} {
    %c0_i32 = arith.constant 0 : i32
    %0 = arith.cmpi eq, %arg2, %c0_i32 : i32
    %1 = arith.extui %0 : i1 to i32
    %c0_i32_0 = arith.constant 0 : i32
    %2 = arith.cmpi ne, %1, %c0_i32_0 : i32
    scf.if %2 {
      %cst_9 = arith.constant 0.000000e+00 : f32
      %12 = vector.broadcast %cst_9 : f32 to vector<128x128xf32>
      %c0_10 = arith.constant 0 : index
      %c0_11 = arith.constant 0 : index
      %13 = vector.load %arg6[%c0_10, %c0_11] : memref<128x128xf32, #tpu.memory_space<vmem>>, vector<128x128xf32>
      tpu.vector_store %arg6[%c0_10, %c0_11], %12 {strides = array<i32>} : memref<128x128xf32, #tpu.memory_space<vmem>>, vector<128x128xf32>,
    } else {
    }
    %c0 = arith.constant 0 : index
    %c0_1 = arith.constant 0 : index
    %3 = vector.load %arg6[%c0, %c0_1] : memref<128x128xf32, #tpu.memory_space<vmem>>, vector<128x128xf32>
    %c0_2 = arith.constant 0 : index
    %c0_3 = arith.constant 0 : index
    %4 = vector.load %arg3[%c0_2, %c0_3] : memref<128x128xbf16, #tpu.memory_space<vmem>>, vector<128x128xbf16>
    %c0_4 = arith.constant 0 : index
    %c0_5 = arith.constant 0 : index
    %5 = vector.load %arg4[%c0_4, %c0_5] : memref<128x128xbf16, #tpu.memory_space<vmem>>, vector<128x128xbf16>
    %cst = arith.constant dense<0.000000e+00> : vector<128x128xf32>
    %6 = tpu.matmul %4, %5, %cst {dimension_numbers = #tpu.dot_dimension_numbers<[1], [0], [0], [1], [0, 0, 1, 1], [], []>} : vector<128x128xbf16>, vector<128x128xbf16>, vector<128x128xf32> -> vector<128x128xf32>
    %7 = arith.addf %3, %6 : vector<128x128xf32>
    %c0_6 = arith.constant 0 : index
    %c0_7 = arith.constant 0 : index
    %8 = vector.load %arg6[%c0_6, %c0_7] : memref<128x128xf32, #tpu.memory_space<vmem>>, vector<128x128xf32>
    tpu.vector_store %arg6[%c0_6, %c0_7], %7 {strides = array<i32>} : memref<128x128xf32, #tpu.memory_space<vmem>>, vector<128x128xf32>,
    %c1_i32 = arith.constant 1 : i32
    %9 = arith.cmpi eq, %arg2, %c1_i32 : i32
    %10 = arith.extui %9 : i1 to i32
    %c0_i32_8 = arith.constant 0 : i32
    %11 = arith.cmpi ne, %10, %c0_i32_8 : i32
    scf.if %11 {
      %c0_9 = arith.constant 0 : index
      %c0_10 = arith.constant 0 : index
      %12 = vector.load %arg6[%c0_9, %c0_10] : memref<128x128xf32, #tpu.memory_space<vmem>>, vector<128x128xf32>
      %13 = arith.truncf %12 : vector<128x128xf32> to vector<128x128xbf16>
      %c0_11 = arith.constant 0 : index
      %c0_12 = arith.constant 0 : index
      %14 = vector.load %arg5[%c0_11, %c0_12] : memref<128x128xbf16, #tpu.memory_space<vmem>>, vector<128x128xbf16>
      tpu.vector_store %arg5[%c0_11, %c0_12], %13 {strides = array<i32>} : memref<128x128xbf16, #tpu.memory_space<vmem>>, vector<128x128xbf16>,
    } else {
    }
    return
  }
  func.func @transform_0(%arg0: i32, %arg1: i32, %arg2: i32) -> (i32, i32) {
    %c0_i32 = arith.constant 0 : i32
    return %arg0, %arg2 : i32, i32
  }
  func.func @transform_1(%arg0: i32, %arg1: i32, %arg2: i32) -> (i32, i32) {
    %c0_i32 = arith.constant 0 : i32
    return %arg2, %arg1 : i32, i32
  }
  func.func @transform_2(%arg0: i32, %arg1: i32, %arg2: i32) -> (i32, i32) {
    %c0_i32 = arith.constant 0 : i32
    return %arg0, %arg1 : i32, i32
  }
}

module attributes {stable_mosaic.version = 11 : i64} {
  func.func @_matmul_kernel(%arg0: i32, %arg1: i32, %arg2: i32, %arg3: memref<128x128xbf16, #tpu.memory_space<vmem>>, %arg4: memref<128x128xbf16, #tpu.memory_space<vmem>>, %arg5: memref<128x128xf32, #tpu.memory_space<vmem>>, %arg6: memref<128x128xf32, #tpu.memory_space<vmem>>) attributes {dimension_semantics = [#tpu.dimension_semantics<parallel>, #tpu.dimension_semantics<parallel>, #tpu.dimension_semantics<arbitrary>], iteration_bounds = array<i64: 2, 2, 2>, scalar_prefetch = 0 : i64, scratch_operands = 1 : i64, tpu.core_type = #tpu.core_type<tc>, window_params = [{transform_indices = @transform_0, window_bounds = array<i64: 128, 128>}, {transform_indices = @transform_1, window_bounds = array<i64: 128, 128>}, {transform_indices = @transform_2, window_bounds = array<i64: 128, 128>}]} {
    %c0_i32 = arith.constant 0 : i32
    %0 = arith.cmpi eq, %arg2, %c0_i32 : i32
    %1 = arith.extui %0 : i1 to i32
    %c0_i32_0 = arith.constant 0 : i32
    %2 = arith.cmpi ne, %1, %c0_i32_0 : i32
    scf.if %2 {
      %cst_9 = arith.constant 0.000000e+00 : f32
      %12 = vector.broadcast %cst_9 : f32 to vector<128x128xf32>
      %c0_10 = arith.constant 0 : index
      %c0_11 = arith.constant 0 : index
      %13 = vector.load %arg6[%c0_10, %c0_11] : memref<128x128xf32, #tpu.memory_space<vmem>>, vector<128x128xf32>
      tpu.vector_store %arg6[%c0_10, %c0_11], %12 {strides = array<i32>} : memref<128x128xf32, #tpu.memory_space<vmem>>, vector<128x128xf32>,
    } else {
    }
    %c0 = arith.constant 0 : index
    %c0_1 = arith.constant 0 : index
    %3 = vector.load %arg6[%c0, %c0_1] : memref<128x128xf32, #tpu.memory_space<vmem>>, vector<128x128xf32>
    %c0_2 = arith.constant 0 : index
    %c0_3 = arith.constant 0 : index
    %4 = vector.load %arg3[%c0_2, %c0_3] : memref<128x128xbf16, #tpu.memory_space<vmem>>, vector<128x128xbf16>
    %c0_4 = arith.constant 0 : index
    %c0_5 = arith.constant 0 : index
    %5 = vector.load %arg4[%c0_4, %c0_5] : memref<128x128xbf16, #tpu.memory_space<vmem>>, vector<128x128xbf16>
    %cst = arith.constant dense<0.000000e+00> : vector<128x128xf32>
    %6 = tpu.matmul %4, %5, %cst {dimension_numbers = #tpu.dot_dimension_numbers<[1], [0], [0], [1], [0, 0, 1, 1], [], []>} : vector<128x128xbf16>, vector<128x128xbf16>, vector<128x128xf32> -> vector<128x128xf32>
    %7 = arith.addf %3, %6 : vector<128x128xf32>
    %c0_6 = arith.constant 0 : index
    %c0_7 = arith.constant 0 : index
    %8 = vector.load %arg6[%c0_6, %c0_7] : memref<128x128xf32, #tpu.memory_space<vmem>>, vector<128x128xf32>
    tpu.vector_store %arg6[%c0_6, %c0_7], %7 {strides = array<i32>} : memref<128x128xf32, #tpu.memory_space<vmem>>, vector<128x128xf32>,
    %c1_i32 = arith.constant 1 : i32
    %9 = arith.cmpi eq, %arg2, %c1_i32 : i32
    %10 = arith.extui %9 : i1 to i32
    %c0_i32_8 = arith.constant 0 : i32
    %11 = arith.cmpi ne, %10, %c0_i32_8 : i32
    scf.if %11 {
      %c0_9 = arith.constant 0 : index
      %c0_10 = arith.constant 0 : index
      %12 = vector.load %arg6[%c0_9, %c0_10] : memref<128x128xf32, #tpu.memory_space<vmem>>, vector<128x128xf32>
      %c0_11 = arith.constant 0 : index
      %c0_12 = arith.constant 0 : index
      %13 = vector.load %arg5[%c0_11, %c0_12] : memref<128x128xf32, #tpu.memory_space<vmem>>, vector<128x128xf32>
      tpu.vector_store %arg5[%c0_11, %c0_12], %12 {strides = array<i32>} : memref<128x128xf32, #tpu.memory_space<vmem>>, vector<128x128xf32>,
    } else {
    }
    return
  }
  func.func @transform_0(%arg0: i32, %arg1: i32, %arg2: i32) -> (i32, i32) {
    %c0_i32 = arith.constant 0 : i32
    return %arg0, %arg2 : i32, i32
  }
  func.func @transform_1(%arg0: i32, %arg1: i32, %arg2: i32) -> (i32, i32) {
    %c0_i32 = arith.constant 0 : i32
    return %arg2, %arg1 : i32, i32
  }
  func.func @transform_2(%arg0: i32, %arg1: i32, %arg2: i32) -> (i32, i32) {
    %c0_i32 = arith.constant 0 : i32
    return %arg0, %arg1 : i32, i32
  }
}

</mosaic_0001>

<bundles_post_ra>
// kernel: feed_forward.3
= control target key start
LH: loop header
LB: loop body
LE: loop exit
PB: predicated region body
PF: predicated region fallthrough
CT: control target
= control target key end

     0   :  { %s1698_s0 = inlined_call_operand.vmem [shape: bf16[256,256], index: 0, kind: input, shape index: {}]   ;;  %s1699_s1 = inlined_call_operand.vmem [shape: bf16[256,256], index: 1, kind: input, shape index: {}]   ;;  %s1700_s2 = inlined_call_operand.vmem [shape: bf16[256,256], index: 2, kind: output, shape index: {}]  }
   0x1   :  { %1703 = sst [smem:[#allocation8_spill]] %s1700_s2 }
   0x2   :  { %s1424_s9 = smov 0   ;;  %s1426_s10 = smov 0  }
   0x3   :  { %s1428_s11 = smov 0   ;;  %s1430_s12 = smov 0  }
   0x4   :  { %s1432_s13 = smov 0   ;;  %s1434_s14 = smov 0  }
   0x5   :  { %s1436_s15 = smov 0   ;;  %s1438_s16 = smov 0  }
   0x6   :  { %s1440_s17 = smov 0   ;;  %s1442_s18 = smov 0  }
   0x7   :  { %s1444_s19 = smov 0   ;;  %s1446_s20 = smov 0  }
   0x8   :  { %s1448_s21 = smov 0  }
   0x9 LB: > { %s24_s23 = sadd.s32 1, %s1394_s18  ;;  %s27_s24 = sadd.s32 1, %s1398_s19  ;;  %s1406_s21 = sphi %s1448_s21, %s12_s21   ;;  %s1402_s20 = sphi %s1446_s20, %s1726_s20   ;;  %s1398_s19 = sphi %s1444_s19, %s1725_s19   ;;  %s1394_s18 = sphi %s1442_s18, %s1724_s18   ;;  %s1390_s17 = sphi %s1440_s17, %s1723_s17   ;;  %s1386_s16 = sphi %s1438_s16, %s1722_s16   ;;  %s1382_s15 = sphi %s1436_s15, %s1721_s15   ;;  %s1378_s14 = sphi %s1434_s14, %s1720_s14   ;;  %s1374_s13 = sphi %s1432_s13, %s1719_s13   ;;  %s1370_s12 = sphi %s1430_s12, %s1718_s12   ;;  %s1366_s11 = sphi %s1428_s11, %s1717_s11   ;;  %s1362_s10 = sphi %s1426_s10, %s1716_s10   ;;  %s1358_s9 = sphi %s1424_s9, %s1715_s9  }
   0xa   : > { %p25_p0 = scmp.ge.s32.totalorder %s24_s23, 2  ;;  %s31_s25 = sadd.s32 1, %s1402_s20 }
   0xb   : > { %s40_s26 = sadd.s32 1, %s1378_s14  ;;  %p47_p1 = scmp.ne.s32.totalorder %s1378_s14, %s1374_s13 }
   0xc   : > { %s1728_s23 = smov (%p25_p0, %s24_s23), 0  ;;  %s1730_s24 = smov (!%p25_p0, %s27_s24), %s1398_s19 }
   0xd   : > { %1704 = sst [smem:[#allocation6_spill]] %s1728_s23  ;;  %s36_s27 = ssub.s32 %s1394_s18, %s1728_s23 }
   0xe   : > { %p29_p2 = scmp.ge.s32.totalorder %s1730_s24, 2  ;;  %p48_p3 = scmp.eq.s32.totalorder %s1406_s21, 0 }
   0xf   : > { %s68_s28 = sadd.s32 1, %s1370_s12  ;;  %p75_p4 = scmp.ne.s32.totalorder %s1370_s12, %s1366_s11 }
  0x10   : > { %s1732_s24 = smov (%p29_p2, %s1730_s24), 0  ;;  %s1734_s25 = smov (!%p29_p2, %s31_s25), %s1402_s20 }
  0x11   : > { %1705 = sst [smem:[#allocation7_spill]] %s1732_s24  ;;  %p1508_p5 = por %p48_p3, %p47_p1 }
  0x12   : > { %s64_s30 = ssub.s32 %s1398_s19, %s1732_s24  ;;  %p33_p6 = scmp.ge.s32.totalorder %s1734_s25, 2 }
  0x13   : > { %s65_s3 = sor.u32 %s64_s30, %s36_s27  ;;  %p1514_p8 = por %p75_p4, %p48_p3 }
  0x14   : > { %p66_p7 = scmp.eq.s32.totalorder %s65_s3, 0  ;;  %s1736_s25 = smov (%p33_p6, %s1734_s25), 0 }
  0x15   : > { %s35_s6 = ssub.s32 %s1402_s20, %s1736_s25  ;;  %s96_s7 = sadd.s32 1, %s1362_s10 }
  0x16   : > { %s1521_s5 = scalar_select %p66_p7, %s1370_s12, %s68_s28  }
  0x17   : > { %s37_s8 = sor.u32 %s36_s27, %s35_s6  ;;  %s93_s22 = sor.u32 %s64_s30, %s35_s6 }
  0x18   : > { %p38_p9 = scmp.eq.s32.totalorder %s37_s8, 0  ;;  %p94_p10 = scmp.eq.s32.totalorder %s93_s22, 0 }
  0x19   : > { %p106_p11 = scmp.ne.s32.totalorder %s1362_s10, %s1358_s9  ;;  %s1708_s24 = sadd.s32 4294967295, %s1406_s21  }
  0x1a   : > { %p107_p12 = scmp.eq.s32.totalorder %s1708_s24, 7  ;;  %p1000_p0 = scmp.ge.s32.totalorder %s1406_s21, 8 }
  0x1b   : > { %s1531_s23 = scalar_select %p38_p9, %s1378_s14, %s40_s26  }
  0x1c   : > { %s1534_s3 = scalar_select %p94_p10, %s1362_s10, %s96_s7  }
  0x1d   : > { %p1536_p13 = por %p107_p12, %p106_p11  ;;  %129 = sbr.rel (%p1000_p0) target bundleno = 68 (0x44), region = 16 }
  0x24   : > { %132 = sbr.rel (!%p1508_p5) target bundleno = 52 (0x34), region = 20  ;;  %s134_s22 = sand.u32 (%p1508_p5), 1, %s1378_s14  }
  0x25   : > { %s1053_s27 = sshll.u32 (%p1508_p5), %s1402_s20, 5  ;;  %s1001_s24 = sshll.u32 (%p1508_p5), %s134_s22, 6 }
  0x26   : > { %s139_s26 = sadd.s32 (%p1508_p5), %s1394_s18, %s1053_s27  ;;  %s136_s29 = scalar_lea.vmem (%p1508_p5), [#allocation3], %s1001_s24 }
  0x27   : > { %s1004_s28 = sshll.u32 (%p1508_p5), %s139_s26, 2 }
  0x28   : > { %s1549_s7 = scalar_lea.vmem (%p1508_p5), %s1698_s0, %s1004_s28 }
  0x29   : > { %v157_v0 = vld [vmem:[%s1549_s7] sm:$0xf] (%p1508_p5)  ;;  %v159_v1 = vld [vmem:[%s1549_s7 + $0x8] sm:$0xf] (%p1508_p5)  ;;  %v161_v2 = vld [vmem:[%s1549_s7 + $0x10] sm:$0xf] (%p1508_p5) }
  0x2a   : > { %158 = vst [vmem:[%s136_s29] sm:$0xf] (%p1508_p5), %v157_v0  ;;  %160 = vst [vmem:[%s136_s29 + $0x4] sm:$0xf] (%p1508_p5), %v159_v1  ;;  %v163_v3 = vld [vmem:[%s1549_s7 + $0x18] sm:$0xf] (%p1508_p5) }
  0x2b   : > { %162 = vst [vmem:[%s136_s29 + $0x8] sm:$0xf] %v161_v2  ;;  %v165_v4 = vld [vmem:[%s1549_s7 + $0x20] sm:$0xf]  ;;  %v167_v5 = vld [vmem:[%s1549_s7 + $0x28] sm:$0xf] }
  0x2c   : > { %164 = vst [vmem:[%s136_s29 + $0xc] sm:$0xf] %v163_v3  ;;  %166 = vst [vmem:[%s136_s29 + $0x10] sm:$0xf] %v165_v4  ;;  %v169_v6 = vld [vmem:[%s1549_s7 + $0x30] sm:$0xf] }
  0x2d   : > { %168 = vst [vmem:[%s136_s29 + $0x14] sm:$0xf] %v167_v5  ;;  %v171_v7 = vld [vmem:[%s1549_s7 + $0x38] sm:$0xf]  ;;  %v173_v8 = vld [vmem:[%s1549_s7 + $0x40] sm:$0xf] }
  0x2e   : > { %170 = vst [vmem:[%s136_s29 + $0x18] sm:$0xf] %v169_v6  ;;  %172 = vst [vmem:[%s136_s29 + $0x1c] sm:$0xf] %v171_v7  ;;  %v175_v9 = vld [vmem:[%s1549_s7 + $0x48] sm:$0xf] }
  0x2f   : > { %174 = vst [vmem:[%s136_s29 + $0x20] sm:$0xf] %v173_v8  ;;  %v177_v10 = vld [vmem:[%s1549_s7 + $0x50] sm:$0xf]  ;;  %v179_v11 = vld [vmem:[%s1549_s7 + $0x58] sm:$0xf] }
  0x30   : > { %176 = vst [vmem:[%s136_s29 + $0x24] sm:$0xf] %v175_v9  ;;  %178 = vst [vmem:[%s136_s29 + $0x28] sm:$0xf] %v177_v10  ;;  %v181_v12 = vld [vmem:[%s1549_s7 + $0x60] sm:$0xf] }
  0x31   : > { %180 = vst [vmem:[%s136_s29 + $0x2c] sm:$0xf] %v179_v11  ;;  %v183_v13 = vld [vmem:[%s1549_s7 + $0x68] sm:$0xf]  ;;  %v185_v14 = vld [vmem:[%s1549_s7 + $0x70] sm:$0xf] }
  0x32   : > { %182 = vst [vmem:[%s136_s29 + $0x30] sm:$0xf] %v181_v12  ;;  %184 = vst [vmem:[%s136_s29 + $0x34] sm:$0xf] %v183_v13  ;;  %v187_v15 = vld [vmem:[%s1549_s7 + $0x78] sm:$0xf] }
  0x33   : > { %186 = vst [vmem:[%s136_s29 + $0x38] sm:$0xf] %v185_v14  ;;  %188 = vst [vmem:[%s136_s29 + $0x3c] sm:$0xf] %v187_v15 }
  0x34 PF: > { %243 = sbr.rel (!%p1514_p8) target bundleno = 68 (0x44), region = 61  ;;  %s245_s8 = sand.u32 (%p1514_p8), 1, %s1370_s12  }
  0x35   : > { %s1054_s22 = sshll.u32 (%p1514_p8), %s1394_s18, 5  ;;  %s1005_s27 = sshll.u32 (%p1514_p8), %s245_s8, 6 }
  0x36   : > { %s250_s24 = sadd.s32 (%p1514_p8), %s1398_s19, %s1054_s22  ;;  %s247_s4 = scalar_lea.vmem (%p1514_p8), [#allocation4], %s1005_s27 }
  0x37   : > { %s1008_s26 = sshll.u32 (%p1514_p8), %s250_s24, 2 }
  0x38   : > { %s1575_s6 = scalar_lea.vmem (%p1514_p8), %s1699_s1, %s1008_s26 }
  0x39   : > { %v268_v16 = vld [vmem:[%s1575_s6] sm:$0xf] (%p1514_p8)  ;;  %v270_v17 = vld [vmem:[%s1575_s6 + $0x8] sm:$0xf] (%p1514_p8)  ;;  %v272_v18 = vld [vmem:[%s1575_s6 + $0x10] sm:$0xf] (%p1514_p8) }
  0x3a   : > { %269 = vst [vmem:[%s247_s4] sm:$0xf] (%p1514_p8), %v268_v16  ;;  %271 = vst [vmem:[%s247_s4 + $0x4] sm:$0xf] (%p1514_p8), %v270_v17  ;;  %v274_v19 = vld [vmem:[%s1575_s6 + $0x18] sm:$0xf] (%p1514_p8) }
  0x3b   : > { %273 = vst [vmem:[%s247_s4 + $0x8] sm:$0xf] %v272_v18  ;;  %v276_v20 = vld [vmem:[%s1575_s6 + $0x20] sm:$0xf]  ;;  %v278_v21 = vld [vmem:[%s1575_s6 + $0x28] sm:$0xf] }
  0x3c   : > { %275 = vst [vmem:[%s247_s4 + $0xc] sm:$0xf] %v274_v19  ;;  %277 = vst [vmem:[%s247_s4 + $0x10] sm:$0xf] %v276_v20  ;;  %v280_v22 = vld [vmem:[%s1575_s6 + $0x30] sm:$0xf] }
  0x3d   : > { %279 = vst [vmem:[%s247_s4 + $0x14] sm:$0xf] %v278_v21  ;;  %v282_v23 = vld [vmem:[%s1575_s6 + $0x38] sm:$0xf]  ;;  %v284_v24 = vld [vmem:[%s1575_s6 + $0x40] sm:$0xf] }
  0x3e   : > { %281 = vst [vmem:[%s247_s4 + $0x18] sm:$0xf] %v280_v22  ;;  %283 = vst [vmem:[%s247_s4 + $0x1c] sm:$0xf] %v282_v23  ;;  %v286_v25 = vld [vmem:[%s1575_s6 + $0x48] sm:$0xf] }
  0x3f   : > { %285 = vst [vmem:[%s247_s4 + $0x20] sm:$0xf] %v284_v24  ;;  %v288_v26 = vld [vmem:[%s1575_s6 + $0x50] sm:$0xf]  ;;  %v290_v27 = vld [vmem:[%s1575_s6 + $0x58] sm:$0xf] }
  0x40   : > { %287 = vst [vmem:[%s247_s4 + $0x24] sm:$0xf] %v286_v25  ;;  %289 = vst [vmem:[%s247_s4 + $0x28] sm:$0xf] %v288_v26  ;;  %v292_v28 = vld [vmem:[%s1575_s6 + $0x60] sm:$0xf] }
  0x41   : > { %291 = vst [vmem:[%s247_s4 + $0x2c] sm:$0xf] %v290_v27  ;;  %v294_v29 = vld [vmem:[%s1575_s6 + $0x68] sm:$0xf]  ;;  %v296_v30 = vld [vmem:[%s1575_s6 + $0x70] sm:$0xf] }
  0x42   : > { %293 = vst [vmem:[%s247_s4 + $0x30] sm:$0xf] %v292_v28  ;;  %295 = vst [vmem:[%s247_s4 + $0x34] sm:$0xf] %v294_v29  ;;  %v298_v31 = vld [vmem:[%s1575_s6 + $0x78] sm:$0xf] }
  0x43   : > { %297 = vst [vmem:[%s247_s4 + $0x38] sm:$0xf] %v296_v30  ;;  %299 = vst [vmem:[%s247_s4 + $0x3c] sm:$0xf] %v298_v31 }
  0x44 PF: > { %p1009_p1 = scmp.ge.s32.totalorder %s1406_s21, 1  ;;  %p353_p2 = scmp.lt.s32.totalorder %s1406_s21, 9 }
  0x46   : > { %p354_p3 = pnand %p1009_p1, %p353_p2 }
  0x47   : > { %s360_s7 = sand.u32 (!%p354_p3), 1, %s1374_s13   ;;  %s367_s29 = sand.u32 (!%p354_p3), 1, %s1366_s11  }
  0x48   : > { %357 = sbr.rel (%p354_p3) target bundleno = 374 (0x176), region = 102  ;;  %s1010_s8 = sshll.u32 (!%p354_p3), %s360_s7, 6 }
  0x49   : > { %s1011_s22 = sshll.u32 (!%p354_p3), %s367_s29, 6  ;;  %s388_s27 = sand.u32 (!%p354_p3), 1, %s1358_s9  }
  0x4a   : > { %s1012_s24 = sshll.u32 (!%p354_p3), %s388_s27, 6  ;;  %s1598_s26 = scalar_lea.vmem (!%p354_p3), [#allocation3], %s1010_s8 }
  0x4b   : > { %s1600_s28 = scalar_lea.vmem (!%p354_p3), [#allocation4], %s1011_s22  ;;  %s1602_s30 = scalar_lea.vmem (!%p354_p3), [#allocation5], %s1012_s24 }
  0x4c   : > { %p1013_p4 = scmp.ne.s32.totalorder (!%p354_p3), %s1382_s15, 0 }
  0x4f   : > { %398 = sbr.rel (%p1013_p4) target bundleno = 88 (0x58), region = 114  ;;  %v1408_v32 = vmov (!%p1013_p4), 0.0  }
  0x50   : > { %399 = vst [vmem:[#allocation2] sm:$0xff] (!%p1013_p4), %v1408_v32  ;;  %400 = vst [vmem:[#allocation2 + $0x8] sm:$0xff] (!%p1013_p4), %v1408_v32 }
  0x51   : > { %401 = vst [vmem:[#allocation2 + $0x10] sm:$0xff] (!%p1013_p4), %v1408_v32  ;;  %402 = vst [vmem:[#allocation2 + $0x18] sm:$0xff] (!%p1013_p4), %v1408_v32 }
  0x52   : > { %403 = vst [vmem:[#allocation2 + $0x20] sm:$0xff] (!%p1013_p4), %v1408_v32  ;;  %404 = vst [vmem:[#allocation2 + $0x28] sm:$0xff] (!%p1013_p4), %v1408_v32 }
  0x53   : > { %405 = vst [vmem:[#allocation2 + $0x30] sm:$0xff] (!%p1013_p4), %v1408_v32  ;;  %406 = vst [vmem:[#allocation2 + $0x38] sm:$0xff] (!%p1013_p4), %v1408_v32 }
  0x54   : > { %407 = vst [vmem:[#allocation2 + $0x40] sm:$0xff] (!%p1013_p4), %v1408_v32  ;;  %408 = vst [vmem:[#allocation2 + $0x48] sm:$0xff] (!%p1013_p4), %v1408_v32 }
  0x55   : > { %409 = vst [vmem:[#allocation2 + $0x50] sm:$0xff] (!%p1013_p4), %v1408_v32  ;;  %410 = vst [vmem:[#allocation2 + $0x58] sm:$0xff] (!%p1013_p4), %v1408_v32 }
  0x56   : > { %411 = vst [vmem:[#allocation2 + $0x60] sm:$0xff] %v1408_v32  ;;  %412 = vst [vmem:[#allocation2 + $0x68] sm:$0xff] %v1408_v32 }
  0x57   : > { %413 = vst [vmem:[#allocation2 + $0x70] sm:$0xff] %v1408_v32  ;;  %414 = vst [vmem:[#allocation2 + $0x78] sm:$0xff] %v1408_v32 }
  0x58 PF: > { %v1288_v33 = vld [vmem:[%s1600_s28] sm:$0xff]   ;;  %v1289_v34 = vld [vmem:[%s1600_s28 + $0x8] sm:$0xff]   ;;  %v1290_v35 = vld [vmem:[%s1600_s28 + $0x10] sm:$0xff]   ;;  %p1030_p5 = scmp.ne.s32.totalorder %s1382_s15, 1 }
  0x59   : > { %1135 = vmatprep.subr.bf16.mxu0 %v1288_v33  ;;  %1167 = vmatprep.subr.bf16.mxu1 %v1288_v33  ;;  %v1291_v36 = vld [vmem:[%s1600_s28 + $0x18] sm:$0xff]   ;;  %v1296_v37 = vld [vmem:[%s1598_s26] sm:$0xff]   ;;  %v1293_v40 = vld [vmem:[%s1600_s28 + $0x28] sm:$0xff]  }
  0x5a   : > { %1136 = vmatpush3.bf16.msra.mxu0 %v1288_v33  ;;  %1175 = vmatpush3.bf16.msra.mxu1 %v1288_v33  ;;  %v1297_v38 = vld [vmem:[%s1598_s26 + $0x20] sm:$0xff]   ;;  %v1294_v41 = vld [vmem:[%s1600_s28 + $0x30] sm:$0xff]   ;;  %v1295_v42 = vld [vmem:[%s1600_s28 + $0x38] sm:$0xff]  }
  0x5b   : > { %1137 = vmatprep.subr.bf16.mxu0 %v1289_v34  ;;  %1168 = vmatprep.subr.bf16.mxu1 %v1289_v34  ;;  %v1292_v39 = vld [vmem:[%s1600_s28 + $0x20] sm:$0xff]   ;;  %v1298_v43 = vld [vmem:[%s1598_s26 + $0x8] sm:$0xff]   ;;  %v1300_v45 = vld [vmem:[%s1598_s26 + $0x10] sm:$0xff]  }
  0x5c   : > { %1151 = vmatprep.mubr.bf16.mxu0 %v1296_v37  ;;  %1159 = vmatprep.mubr.bf16.mxu1 %v1297_v38  ;;  %v1299_v44 = vld [vmem:[%s1598_s26 + $0x28] sm:$0xff]   ;;  %v1301_v46 = vld [vmem:[%s1598_s26 + $0x30] sm:$0xff]   ;;  %v1302_v47 = vld [vmem:[%s1598_s26 + $0x18] sm:$0xff]  }
  0x5d   : > { %v1303_v48 = vld [vmem:[%s1598_s26 + $0x38] sm:$0xff]   ;;  %v417_v49 = vld [vmem:[#allocation2 + $0x10] sm:$0xff]  ;;  %v415_v51 = vld [vmem:[#allocation2] sm:$0xff] }
  0x5e   : > { %1138 = vmatpush3.bf16.msra.mxu0 %v1289_v34  ;;  %1176 = vmatpush3.bf16.msra.mxu1 %v1289_v34  ;;  %v425_v50 = vld [vmem:[#allocation2 + $0x50] sm:$0xff]  ;;  %v423_v52 = vld [vmem:[#allocation2 + $0x40] sm:$0xff]  ;;  %v418_v55 = vld [vmem:[#allocation2 + $0x18] sm:$0xff] }
  0x5f   : > { %1139 = vmatprep.subr.bf16.mxu0 %v1290_v35  ;;  %1169 = vmatprep.subr.bf16.mxu1 %v1290_v35  ;;  %v426_v56 = vld [vmem:[#allocation2 + $0x58] sm:$0xff]  ;;  %v416_v61 = vld [vmem:[#allocation2 + $0x8] sm:$0xff]  ;;  %v421_v9 = vld [vmem:[#allocation2 + $0x30] sm:$0xff] }
  0x60   : > { %v424_v62 = vld [vmem:[#allocation2 + $0x48] sm:$0xff]  ;;  %v429_v10 = vld [vmem:[#allocation2 + $0x70] sm:$0xff]  ;;  %v419_v11 = vld [vmem:[#allocation2 + $0x20] sm:$0xff] }
  0x61   : > { %v427_v12 = vld [vmem:[#allocation2 + $0x60] sm:$0xff]  ;;  %v422_v15 = vld [vmem:[#allocation2 + $0x38] sm:$0xff]  ;;  %v420_v21 = vld [vmem:[#allocation2 + $0x28] sm:$0xff] }
  0x62   : > { %1140 = vmatpush3.bf16.msra.mxu0 %v1290_v35  ;;  %1177 = vmatpush3.bf16.msra.mxu1 %v1290_v35  ;;  %v430_v16 = vld [vmem:[#allocation2 + $0x78] sm:$0xff]  ;;  %v428_v22 = vld [vmem:[#allocation2 + $0x68] sm:$0xff] }
  0x63   : > { %1141 = vmatprep.subr.bf16.mxu0 %v1291_v36  ;;  %1170 = vmatprep.subr.bf16.mxu1 %v1291_v36 }
  0x66   : > { %1142 = vmatpush3.bf16.msra.mxu0 %v1291_v36  ;;  %1178 = vmatpush3.bf16.msra.mxu1 %v1291_v36 }
  0x67   : > { %1143 = vmatprep.subr.bf16.mxu0 %v1292_v39  ;;  %1171 = vmatprep.subr.bf16.mxu1 %v1292_v39 }
  0x6a   : > { %1144 = vmatpush3.bf16.msra.mxu0 %v1292_v39  ;;  %1179 = vmatpush3.bf16.msra.mxu1 %v1292_v39 }
  0x6b   : > { %1145 = vmatprep.subr.bf16.mxu0 %v1293_v40  ;;  %1172 = vmatprep.subr.bf16.mxu1 %v1293_v40 }
  0x6e   : > { %1146 = vmatpush3.bf16.msra.mxu0 %v1293_v40  ;;  %1180 = vmatpush3.bf16.msra.mxu1 %v1293_v40 }
  0x6f   : > { %1147 = vmatprep.subr.bf16.mxu0 %v1294_v41  ;;  %1173 = vmatprep.subr.bf16.mxu1 %v1294_v41 }
  0x72   : > { %1148 = vmatpush3.bf16.msra.mxu0 %v1294_v41  ;;  %1181 = vmatpush3.bf16.msra.mxu1 %v1294_v41 }
  0x73   : > { %1149 = vmatprep.subr.bf16.mxu0 %v1295_v42  ;;  %1174 = vmatprep.subr.bf16.mxu1 %v1295_v42 }
  0x76   : > { %1150 = vmatpush3.bf16.msra.mxu0 %v1295_v42  ;;  %1182 = vmatpush3.bf16.msra.mxu1 %v1295_v42 }
  0x79   : > { %1152 = vmatmul.mubr.bf16.vlgmr.msra.gmra.mrb[0].mxu0 %v1298_v43  ;;  %1160 = vmatmul.mubr.bf16.vlgmr.msra.gmra.mrb[0].mxu1 %v1299_v44 }
  0x7a   : > { %1155 = vmatprep.mubr.bf16.mxu0 %v1300_v45  ;;  %1163 = vmatprep.mubr.bf16.mxu1 %v1301_v46 }
  0x81   : > { %1156 = vmatmul.mubr.bf16.gmra.mrb[4].mxu0 %v1302_v47  ;;  %1164 = vmatmul.mubr.bf16.gmra.mrb[4].mxu1 %v1303_v48 }
 0x14c   : > { %v1153_v53 = vpop.f32.mrb[0].mxu0  ;;  %v1161_v54 = vpop.f32.mrb[0].mxu1 }
 0x14d   : > { %v658_v57 = vadd.f32 %v1153_v53, %v417_v49  ;;  %v666_v58 = vadd.f32 %v1161_v54, %v425_v50  ;;  %v593_v59 = vpop.f32.mrb[1].mxu0  ;;  %v625_v60 = vpop.f32.mrb[1].mxu1 }
 0x14e   : > { %v656_v63 = vadd.f32 %v593_v59, %v415_v51  ;;  %v664_v0 = vadd.f32 %v625_v60, %v423_v52  ;;  %v1154_v1 = vpop.f32.mrb[2].mxu0  ;;  %v1162_v2 = vpop.f32.mrb[2].mxu1 }
 0x14f   : > { %674 = vst [vmem:[#allocation2 + $0x10] sm:$0xff] %v658_v57  ;;  %682 = vst [vmem:[#allocation2 + $0x50] sm:$0xff] %v666_v58  ;;  %v659_v3 = vadd.f32 %v1154_v1, %v418_v55  ;;  %v667_v4 = vadd.f32 %v1162_v2, %v426_v56  ;;  %v596_v5 = vpop.f32.mrb[3].mxu0  ;;  %v628_v6 = vpop.f32.mrb[3].mxu1 }
 0x150   : > { %672 = vst [vmem:[#allocation2] sm:$0xff] %v656_v63  ;;  %680 = vst [vmem:[#allocation2 + $0x40] sm:$0xff] %v664_v0  ;;  %v657_v7 = vadd.f32 %v596_v5, %v416_v61  ;;  %v665_v8 = vadd.f32 %v628_v6, %v424_v62 }
 0x151   : > { %675 = vst [vmem:[#allocation2 + $0x18] sm:$0xff] %v659_v3  ;;  %683 = vst [vmem:[#allocation2 + $0x58] sm:$0xff] %v667_v4 }
 0x152   : > { %673 = vst [vmem:[#allocation2 + $0x8] sm:$0xff] %v657_v7  ;;  %681 = vst [vmem:[#allocation2 + $0x48] sm:$0xff] %v665_v8 }
 0x154   : > { %v1157_v13 = vpop.f32.mrb[4].mxu0  ;;  %v1165_v14 = vpop.f32.mrb[4].mxu1  ;;  %691 = sbr.rel (%p1030_p5) target bundleno = 358 (0x166), region = 118 }
 0x155   : > { %v662_v17 = vadd.f32 %v1157_v13, %v421_v9  ;;  %v670_v18 = vadd.f32 %v1165_v14, %v429_v10  ;;  %v609_v19 = vpop.f32.mrb[5].mxu0  ;;  %v641_v20 = vpop.f32.mrb[5].mxu1 }
 0x156   : > { %v660_v23 = vadd.f32 %v609_v19, %v419_v11  ;;  %v668_v24 = vadd.f32 %v641_v20, %v427_v12  ;;  %v1158_v25 = vpop.f32.mrb[6].mxu0  ;;  %v1166_v26 = vpop.f32.mrb[6].mxu1  ;;  %v694_v35 = vld [vmem:[#allocation2 + $0x10] sm:$0xff] (!%p1030_p5) }
 0x157   : > { %678 = vst [vmem:[#allocation2 + $0x30] sm:$0xff] %v662_v17  ;;  %686 = vst [vmem:[#allocation2 + $0x70] sm:$0xff] %v670_v18  ;;  %v663_v27 = vadd.f32 %v1158_v25, %v422_v15  ;;  %v671_v28 = vadd.f32 %v1166_v26, %v430_v16  ;;  %v612_v29 = vpop.f32.mrb[7].mxu0  ;;  %v644_v30 = vpop.f32.mrb[7].mxu1  ;;  %v692_v33 = vld [vmem:[#allocation2] sm:$0xff] (!%p1030_p5)  ;;  %v702_v47 = vld [vmem:[#allocation2 + $0x50] sm:$0xff] (!%p1030_p5) }
 0x158   : > { %676 = vst [vmem:[#allocation2 + $0x20] sm:$0xff] %v660_v23  ;;  %684 = vst [vmem:[#allocation2 + $0x60] sm:$0xff] %v668_v24  ;;  %v661_v31 = vadd.f32 %v612_v29, %v420_v21  ;;  %v669_v32 = vadd.f32 %v644_v30, %v428_v22  ;;  %v695_v37 = vld [vmem:[#allocation2 + $0x18] sm:$0xff] (!%p1030_p5)  ;;  %v700_v44 = vld [vmem:[#allocation2 + $0x40] sm:$0xff] (!%p1030_p5) }
 0x159   : > { %679 = vst [vmem:[#allocation2 + $0x38] sm:$0xff] %v663_v27  ;;  %687 = vst [vmem:[#allocation2 + $0x78] sm:$0xff] %v671_v28  ;;  %v693_v34 = vld [vmem:[#allocation2 + $0x8] sm:$0xff] (!%p1030_p5)  ;;  %v1080_v40 = vpack.c.bf16 (!%p1030_p5), %v695_v37, %v694_v35  ;;  %v703_v48 = vld [vmem:[#allocation2 + $0x58] sm:$0xff] (!%p1030_p5) }
 0x15a   : > { %677 = vst [vmem:[#allocation2 + $0x28] sm:$0xff] %v661_v31  ;;  %685 = vst [vmem:[#allocation2 + $0x68] sm:$0xff] %v669_v32  ;;  %v1075_v36 = vpack.c.bf16 (!%p1030_p5), %v693_v34, %v692_v33  ;;  %v701_v46 = vld [vmem:[#allocation2 + $0x48] sm:$0xff] (!%p1030_p5)  ;;  %v1100_v50 = vpack.c.bf16 (!%p1030_p5), %v703_v48, %v702_v47 }
 0x15b   : > { %1112 = vst [vmem:[%s1602_s30 + $0x8] sm:$0xff] %v1080_v40   ;;  %v1095_v49 = vpack.c.bf16 %v701_v46, %v700_v44 }
 0x15c   : > { %1076 = vst [vmem:[%s1602_s30] sm:$0xff] %v1075_v36   ;;  %1116 = vst [vmem:[%s1602_s30 + $0x28] sm:$0xff] %v1100_v50  }
 0x15d   : > { %1115 = vst [vmem:[%s1602_s30 + $0x20] sm:$0xff] %v1095_v49  }
 0x15e   : > { %v698_v42 = vld [vmem:[#allocation2 + $0x30] sm:$0xff] }
 0x15f   : > { %v696_v38 = vld [vmem:[#allocation2 + $0x20] sm:$0xff]  ;;  %v706_v53 = vld [vmem:[#allocation2 + $0x70] sm:$0xff] }
 0x160   : > { %v699_v43 = vld [vmem:[#allocation2 + $0x38] sm:$0xff]  ;;  %v704_v51 = vld [vmem:[#allocation2 + $0x60] sm:$0xff] }
 0x161   : > { %v697_v39 = vld [vmem:[#allocation2 + $0x28] sm:$0xff]  ;;  %v1090_v45 = vpack.c.bf16 %v699_v43, %v698_v42  ;;  %v707_v55 = vld [vmem:[#allocation2 + $0x78] sm:$0xff] }
 0x162   : > { %v1085_v41 = vpack.c.bf16 %v697_v39, %v696_v38  ;;  %v705_v52 = vld [vmem:[#allocation2 + $0x68] sm:$0xff]  ;;  %v1110_v56 = vpack.c.bf16 %v707_v55, %v706_v53 }
 0x163   : > { %1114 = vst [vmem:[%s1602_s30 + $0x18] sm:$0xff] %v1090_v45   ;;  %v1105_v54 = vpack.c.bf16 %v705_v52, %v704_v51 }
 0x164   : > { %1113 = vst [vmem:[%s1602_s30 + $0x10] sm:$0xff] %v1085_v41   ;;  %1118 = vst [vmem:[%s1602_s30 + $0x38] sm:$0xff] %v1110_v56  }
 0x165   : > { %1117 = vst [vmem:[%s1602_s30 + $0x30] sm:$0xff] %v1105_v54  }
 0x166 PF: > { %794 = sbr.rel (!%p1536_p13) target bundleno = 374 (0x176), region = 122  ;;  %s1071_s9 = sshll.u32 (%p1536_p13), %s1390_s17, 5  ;;  %v815_v57 = vld [vmem:[%s1602_s30] sm:$0xf] (%p1536_p13)  ;;  %v817_v58 = vld [vmem:[%s1602_s30 + $0x4] sm:$0xf] (%p1536_p13) }
 0x167   : > { %s797_s11 = sadd.s32 (%p1536_p13), %s1386_s16, %s1071_s9  ;;  %s1710_s6 = sld [smem:[#allocation8_spill]] (%p1536_p13)  ;;  %v831_v1 = vld [vmem:[%s1602_s30 + $0x20] sm:$0xf] (%p1536_p13)  ;;  %v833_v2 = vld [vmem:[%s1602_s30 + $0x24] sm:$0xf] (%p1536_p13) }
 0x168   : > { %s1050_s2 = sshll.u32 (%p1536_p13), %s797_s11, 2  ;;  %v835_v3 = vld [vmem:[%s1602_s30 + $0x28] sm:$0xf] (%p1536_p13)  ;;  %v837_v4 = vld [vmem:[%s1602_s30 + $0x2c] sm:$0xf] (%p1536_p13) }
 0x16a   : > { %v827_v63 = vld [vmem:[%s1602_s30 + $0x18] sm:$0xf] (%p1536_p13)  ;;  %v829_v0 = vld [vmem:[%s1602_s30 + $0x1c] sm:$0xf] (%p1536_p13) }
 0x16b   : > { %v823_v61 = vld [vmem:[%s1602_s30 + $0x10] sm:$0xf] (%p1536_p13)  ;;  %v825_v62 = vld [vmem:[%s1602_s30 + $0x14] sm:$0xf] (%p1536_p13)  ;;  %v843_v7 = vld [vmem:[%s1602_s30 + $0x38] sm:$0xf] (%p1536_p13) }
 0x16c   : > { %v839_v5 = vld [vmem:[%s1602_s30 + $0x30] sm:$0xf] (%p1536_p13)  ;;  %v841_v6 = vld [vmem:[%s1602_s30 + $0x34] sm:$0xf] (%p1536_p13)  ;;  %v845_v8 = vld [vmem:[%s1602_s30 + $0x3c] sm:$0xf] (%p1536_p13) }
 0x16d   : > { %v819_v59 = vld [vmem:[%s1602_s30 + $0x8] sm:$0xf]  ;;  %v821_v60 = vld [vmem:[%s1602_s30 + $0xc] sm:$0xf]  ;;  %s799_s4 = scalar_lea.vmem %s1710_s6, %s1050_s2 }
 0x16e   : > { %816 = vst [vmem:[%s799_s4] sm:$0xf] %v815_v57  ;;  %818 = vst [vmem:[%s799_s4 + $0x8] sm:$0xf] %v817_v58 }
 0x16f   : > { %820 = vst [vmem:[%s799_s4 + $0x10] sm:$0xf] %v819_v59  ;;  %822 = vst [vmem:[%s799_s4 + $0x18] sm:$0xf] %v821_v60 }
 0x170   : > { %824 = vst [vmem:[%s799_s4 + $0x20] sm:$0xf] %v823_v61  ;;  %826 = vst [vmem:[%s799_s4 + $0x28] sm:$0xf] %v825_v62 }
 0x171   : > { %828 = vst [vmem:[%s799_s4 + $0x30] sm:$0xf] %v827_v63  ;;  %830 = vst [vmem:[%s799_s4 + $0x38] sm:$0xf] %v829_v0 }
 0x172   : > { %832 = vst [vmem:[%s799_s4 + $0x40] sm:$0xf] %v831_v1  ;;  %834 = vst [vmem:[%s799_s4 + $0x48] sm:$0xf] %v833_v2 }
 0x173   : > { %836 = vst [vmem:[%s799_s4 + $0x50] sm:$0xf] %v835_v3  ;;  %838 = vst [vmem:[%s799_s4 + $0x58] sm:$0xf] %v837_v4 }
 0x174   : > { %840 = vst [vmem:[%s799_s4 + $0x60] sm:$0xf] %v839_v5  ;;  %842 = vst [vmem:[%s799_s4 + $0x68] sm:$0xf] %v841_v6 }
 0x175   : > { %844 = vst [vmem:[%s799_s4 + $0x70] sm:$0xf] %v843_v7  ;;  %846 = vst [vmem:[%s799_s4 + $0x78] sm:$0xf] %v845_v8 }
 0x176 PF: > { %s12_s21 = sadd.s32 1, %s1406_s21   ;;  %s1712_s7 = sld [smem:[#allocation6_spill]] }
 0x177   : > { %p1654_p6 = scmp.ge.s32.totalorder %s12_s21, 10   ;;  %s1713_s29 = sld [smem:[#allocation7_spill]] }
 0x178   : > { %s1715_s9 = smov %s1362_s10  ;;  %s1716_s10 = smov %s1534_s3 }
 0x179   : > { %s1717_s11 = smov %s1370_s12  ;;  %s1718_s12 = smov %s1521_s5 }
 0x17a   : > { %s1719_s13 = smov %s1378_s14  ;;  %s1720_s14 = smov %s1531_s23 }
 0x17b   : > { %s1721_s15 = smov %s1394_s18  ;;  %s1722_s16 = smov %s1398_s19 }
 0x17c   : > { %s1723_s17 = smov %s1402_s20  ;;  %s1724_s18 = smov %s1712_s7 }
 0x17d   : > { %s1725_s19 = smov %s1713_s29  ;;  %s1726_s20 = smov %s1736_s25 }
 0x17e   :  { %11 = sbr.rel (!%p1654_p6) target bundleno = 9 (0x9), region = 202 }

// kernel: feed_forward.4
= control target key start
LH: loop header
LB: loop body
LE: loop exit
PB: predicated region body
PF: predicated region fallthrough
CT: control target
= control target key end

     0   :  { %s2288_s0 = inlined_call_operand.vmem [shape: bf16[256,256], index: 0, kind: input, shape index: {}, may-alias: {0,2}]   ;;  %s2289_s1 = inlined_call_operand.vmem [shape: bf16[256,256], index: 1, kind: input, shape index: {}]   ;;  %s2290_s2 = inlined_call_operand.vmem [shape: bf16[256,256], index: 2, kind: input, shape index: {}, may-alias: {0,2}]   ;;  %s2291_s3 = inlined_call_operand.vmem [shape: bf16[256,256], index: 3, kind: output, shape index: {}]  }
   0x1   :  { %2294 = sst [smem:[#allocation10_spill]] %s2288_s0 }
   0x2   :  { %2295 = sst [smem:[#allocation11_spill]] %s2291_s3 }
   0x3   :  { %s1872_s12 = smov 0   ;;  %s1874_s13 = smov 0  }
   0x4   :  { %s1876_s14 = smov 0   ;;  %s1878_s15 = smov 0  }
   0x5   :  { %s1880_s16 = smov 0   ;;  %s1882_s17 = smov 0  }
   0x6   :  { %s1884_s18 = smov 0   ;;  %s1886_s19 = smov 0  }
   0x7   :  { %s1888_s20 = smov 0   ;;  %s1890_s21 = smov 0  }
   0x8   :  { %s1892_s22 = smov 0   ;;  %s1894_s23 = smov 0  }
   0x9   :  { %s1896_s24 = smov 0  }
   0xa LB: > { %2296 = sst [smem:[#allocation7_spill]] %s1829_s19  ;;  %s25_s26 = sadd.s32 1, %s1837_s21  ;;  %s1849_s24 = sphi %s1896_s24, %s13_s24   ;;  %s1845_s23 = sphi %s1894_s23, %s2322_s23   ;;  %s1841_s22 = sphi %s1892_s22, %s2321_s22   ;;  %s1837_s21 = sphi %s1890_s21, %s2320_s21   ;;  %s1833_s20 = sphi %s1888_s20, %s2319_s20   ;;  %s1829_s19 = sphi %s1886_s19, %s2318_s19   ;;  %s1825_s18 = sphi %s1884_s18, %s2317_s18   ;;  %s1821_s17 = sphi %s1882_s17, %s2316_s17   ;;  %s1817_s16 = sphi %s1880_s16, %s2315_s16   ;;  %s1813_s15 = sphi %s1878_s15, %s2314_s15   ;;  %s1809_s14 = sphi %s1876_s14, %s2313_s14   ;;  %s1805_s13 = sphi %s1874_s13, %s2312_s13   ;;  %s1801_s12 = sphi %s1872_s12, %s2311_s12  }
   0xb   : > { %p26_p0 = scmp.ge.s32.totalorder %s25_s26, 2  ;;  %s28_s27 = sadd.s32 1, %s1841_s22 }
   0xc   : > { %s32_s28 = sadd.s32 1, %s1845_s23  ;;  %s41_s29 = sadd.s32 1, %s1821_s17 }
   0xd   : > { %s2324_s26 = smov (%p26_p0, %s25_s26), 0  ;;  %s2326_s27 = smov (!%p26_p0, %s28_s27), %s1841_s22 }
   0xe   : > { %2297 = sst [smem:[#allocation8_spill]] %s2324_s26  ;;  %s37_s30 = ssub.s32 %s1837_s21, %s2324_s26 }
   0xf   : > { %p48_p1 = scmp.ne.s32.totalorder %s1821_s17, %s1817_s16  ;;  %p30_p2 = scmp.ge.s32.totalorder %s2326_s27, 2 }
  0x10   : > { %p49_p3 = scmp.eq.s32.totalorder %s1849_s24, 0  ;;  %s69_s4 = sadd.s32 1, %s1813_s15 }
  0x11   : > { %p76_p4 = scmp.ne.s32.totalorder %s1813_s15, %s1809_s14  ;;  %s2328_s27 = smov (%p30_p2, %s2326_s27), 0 }
  0x12   : > { %2298 = sst [smem:[#allocation9_spill]] %s2328_s27  ;;  %s2330_s28 = smov (!%p30_p2, %s32_s28), %s1845_s23 }
  0x13   : > { %p1958_p5 = por %p49_p3, %p48_p1  ;;  %s65_s6 = ssub.s32 %s1841_s22, %s2328_s27 }
  0x14   : > { %p34_p6 = scmp.ge.s32.totalorder %s2330_s28, 2  ;;  %s66_s7 = sor.u32 %s65_s6, %s37_s30 }
  0x15   : > { %p67_p7 = scmp.eq.s32.totalorder %s66_s7, 0  ;;  %p1966_p8 = por %p76_p4, %p49_p3 }
  0x16   : > { %s2332_s28 = smov (%p34_p6, %s2330_s28), 0  ;;  %s97_s11 = sadd.s32 1, %s1805_s13 }
  0x17   : > { %s1973_s9 = scalar_select %p67_p7, %s1813_s15, %s69_s4  }
  0x18   : > { %s36_s10 = ssub.s32 %s1845_s23, %s2332_s28  ;;  %p104_p11 = scmp.ne.s32.totalorder %s1805_s13, %s1801_s12 }
  0x19   : > { %s38_s25 = sor.u32 %s37_s30, %s36_s10  ;;  %s94_s26 = sor.u32 %s65_s6, %s36_s10 }
  0x1a   : > { %p39_p9 = scmp.eq.s32.totalorder %s38_s25, 0  ;;  %p95_p10 = scmp.eq.s32.totalorder %s94_s26, 0 }
  0x1b   : > { %s2301_s27 = sadd.s32 4294967295, %s1849_s24   ;;  %p1990_p13 = por %p104_p11, %p49_p3 }
  0x1c   : > { %p136_p12 = scmp.eq.s32.totalorder %s2301_s27, 7  ;;  %p1334_p1 = scmp.ge.s32.totalorder %s1849_s24, 8 }
  0x1d   : > { %s1983_s7 = scalar_select %p39_p9, %s1821_s17, %s41_s29  }
  0x1e   : > { %s1986_s3 = scalar_select %p95_p10, %s1805_s13, %s97_s11  }
  0x1f   : > { %p1994_p0 = por %p136_p12, %p104_p11  ;;  %158 = sbr.rel (%p1334_p1) target bundleno = 90 (0x5a), region = 16 }
  0x26   : > { %161 = sbr.rel (!%p1958_p5) target bundleno = 58 (0x3a), region = 20  ;;  %s163_s25 = sand.u32 (%p1958_p5), 1, %s1821_s17  }
  0x27   : > { %s1392_s26 = sshll.u32 (%p1958_p5), %s1845_s23, 5  ;;  %s1335_s27 = sshll.u32 (%p1958_p5), %s163_s25, 6 }
  0x28   : > { %s168_s29 = sadd.s32 (%p1958_p5), %s1837_s21, %s1392_s26  ;;  %s2304_s0 = sld [smem:[#allocation10_spill]] (%p1958_p5) }
  0x29   : > { %s1338_s30 = sshll.u32 (%p1958_p5), %s168_s29, 2  ;;  %s165_s5 = scalar_lea.vmem (%p1958_p5), [#allocation3], %s1335_s27 }
  0x2e   : > { %s2007_s11 = scalar_lea.vmem %s2304_s0, %s1338_s30 }
  0x2f   : > { %v186_v0 = vld [vmem:[%s2007_s11] sm:$0xf]  ;;  %v188_v1 = vld [vmem:[%s2007_s11 + $0x8] sm:$0xf]  ;;  %v190_v2 = vld [vmem:[%s2007_s11 + $0x10] sm:$0xf] }
  0x30   : > { %187 = vst [vmem:[%s165_s5] sm:$0xf] %v186_v0  ;;  %189 = vst [vmem:[%s165_s5 + $0x4] sm:$0xf] %v188_v1  ;;  %v192_v3 = vld [vmem:[%s2007_s11 + $0x18] sm:$0xf] }
  0x31   : > { %191 = vst [vmem:[%s165_s5 + $0x8] sm:$0xf] %v190_v2  ;;  %v194_v4 = vld [vmem:[%s2007_s11 + $0x20] sm:$0xf]  ;;  %v196_v5 = vld [vmem:[%s2007_s11 + $0x28] sm:$0xf] }
  0x32   : > { %193 = vst [vmem:[%s165_s5 + $0xc] sm:$0xf] %v192_v3  ;;  %195 = vst [vmem:[%s165_s5 + $0x10] sm:$0xf] %v194_v4  ;;  %v198_v6 = vld [vmem:[%s2007_s11 + $0x30] sm:$0xf] }
  0x33   : > { %197 = vst [vmem:[%s165_s5 + $0x14] sm:$0xf] %v196_v5  ;;  %v200_v7 = vld [vmem:[%s2007_s11 + $0x38] sm:$0xf]  ;;  %v202_v8 = vld [vmem:[%s2007_s11 + $0x40] sm:$0xf] }
  0x34   : > { %199 = vst [vmem:[%s165_s5 + $0x18] sm:$0xf] %v198_v6  ;;  %201 = vst [vmem:[%s165_s5 + $0x1c] sm:$0xf] %v200_v7  ;;  %v204_v9 = vld [vmem:[%s2007_s11 + $0x48] sm:$0xf] }
  0x35   : > { %203 = vst [vmem:[%s165_s5 + $0x20] sm:$0xf] %v202_v8  ;;  %v206_v10 = vld [vmem:[%s2007_s11 + $0x50] sm:$0xf]  ;;  %v208_v11 = vld [vmem:[%s2007_s11 + $0x58] sm:$0xf] }
  0x36   : > { %205 = vst [vmem:[%s165_s5 + $0x24] sm:$0xf] %v204_v9  ;;  %207 = vst [vmem:[%s165_s5 + $0x28] sm:$0xf] %v206_v10  ;;  %v210_v12 = vld [vmem:[%s2007_s11 + $0x60] sm:$0xf] }
  0x37   : > { %209 = vst [vmem:[%s165_s5 + $0x2c] sm:$0xf] %v208_v11  ;;  %v212_v13 = vld [vmem:[%s2007_s11 + $0x68] sm:$0xf]  ;;  %v214_v14 = vld [vmem:[%s2007_s11 + $0x70] sm:$0xf] }
  0x38   : > { %211 = vst [vmem:[%s165_s5 + $0x30] sm:$0xf] %v210_v12  ;;  %213 = vst [vmem:[%s165_s5 + $0x34] sm:$0xf] %v212_v13  ;;  %v216_v15 = vld [vmem:[%s2007_s11 + $0x78] sm:$0xf] }
  0x39   : > { %215 = vst [vmem:[%s165_s5 + $0x38] sm:$0xf] %v214_v14  ;;  %217 = vst [vmem:[%s165_s5 + $0x3c] sm:$0xf] %v216_v15 }
  0x3a PF: > { %272 = sbr.rel (!%p1966_p8) target bundleno = 74 (0x4a), region = 61  ;;  %s274_s25 = sand.u32 (%p1966_p8), 1, %s1813_s15  }
  0x3b   : > { %s1393_s26 = sshll.u32 (%p1966_p8), %s1837_s21, 5  ;;  %s1339_s27 = sshll.u32 (%p1966_p8), %s274_s25, 6 }
  0x3c   : > { %s279_s29 = sadd.s32 (%p1966_p8), %s1841_s22, %s1393_s26  ;;  %s276_s8 = scalar_lea.vmem (%p1966_p8), [#allocation4], %s1339_s27 }
  0x3d   : > { %s1342_s30 = sshll.u32 (%p1966_p8), %s279_s29, 2 }
  0x3e   : > { %s2033_s0 = scalar_lea.vmem (%p1966_p8), %s2289_s1, %s1342_s30 }
  0x3f   : > { %v297_v16 = vld [vmem:[%s2033_s0] sm:$0xf] (%p1966_p8)  ;;  %v299_v17 = vld [vmem:[%s2033_s0 + $0x8] sm:$0xf] (%p1966_p8)  ;;  %v301_v18 = vld [vmem:[%s2033_s0 + $0x10] sm:$0xf] (%p1966_p8) }
  0x40   : > { %298 = vst [vmem:[%s276_s8] sm:$0xf] (%p1966_p8), %v297_v16  ;;  %300 = vst [vmem:[%s276_s8 + $0x4] sm:$0xf] (%p1966_p8), %v299_v17  ;;  %v303_v19 = vld [vmem:[%s2033_s0 + $0x18] sm:$0xf] (%p1966_p8) }
  0x41   : > { %302 = vst [vmem:[%s276_s8 + $0x8] sm:$0xf] %v301_v18  ;;  %v305_v20 = vld [vmem:[%s2033_s0 + $0x20] sm:$0xf]  ;;  %v307_v21 = vld [vmem:[%s2033_s0 + $0x28] sm:$0xf] }
  0x42   : > { %304 = vst [vmem:[%s276_s8 + $0xc] sm:$0xf] %v303_v19  ;;  %306 = vst [vmem:[%s276_s8 + $0x10] sm:$0xf] %v305_v20  ;;  %v309_v22 = vld [vmem:[%s2033_s0 + $0x30] sm:$0xf] }
  0x43   : > { %308 = vst [vmem:[%s276_s8 + $0x14] sm:$0xf] %v307_v21  ;;  %v311_v23 = vld [vmem:[%s2033_s0 + $0x38] sm:$0xf]  ;;  %v313_v24 = vld [vmem:[%s2033_s0 + $0x40] sm:$0xf] }
  0x44   : > { %310 = vst [vmem:[%s276_s8 + $0x18] sm:$0xf] %v309_v22  ;;  %312 = vst [vmem:[%s276_s8 + $0x1c] sm:$0xf] %v311_v23  ;;  %v315_v25 = vld [vmem:[%s2033_s0 + $0x48] sm:$0xf] }
  0x45   : > { %314 = vst [vmem:[%s276_s8 + $0x20] sm:$0xf] %v313_v24  ;;  %v317_v26 = vld [vmem:[%s2033_s0 + $0x50] sm:$0xf]  ;;  %v319_v27 = vld [vmem:[%s2033_s0 + $0x58] sm:$0xf] }
  0x46   : > { %316 = vst [vmem:[%s276_s8 + $0x24] sm:$0xf] %v315_v25  ;;  %318 = vst [vmem:[%s276_s8 + $0x28] sm:$0xf] %v317_v26  ;;  %v321_v28 = vld [vmem:[%s2033_s0 + $0x60] sm:$0xf] }
  0x47   : > { %320 = vst [vmem:[%s276_s8 + $0x2c] sm:$0xf] %v319_v27  ;;  %v323_v29 = vld [vmem:[%s2033_s0 + $0x68] sm:$0xf]  ;;  %v325_v30 = vld [vmem:[%s2033_s0 + $0x70] sm:$0xf] }
  0x48   : > { %322 = vst [vmem:[%s276_s8 + $0x30] sm:$0xf] %v321_v28  ;;  %324 = vst [vmem:[%s276_s8 + $0x34] sm:$0xf] %v323_v29  ;;  %v327_v31 = vld [vmem:[%s2033_s0 + $0x78] sm:$0xf] }
  0x49   : > { %326 = vst [vmem:[%s276_s8 + $0x38] sm:$0xf] %v325_v30  ;;  %328 = vst [vmem:[%s276_s8 + $0x3c] sm:$0xf] %v327_v31 }
  0x4a PF: > { %383 = sbr.rel (!%p1990_p13) target bundleno = 90 (0x5a), region = 102  ;;  %s385_s11 = sand.u32 (%p1990_p13), 1, %s1805_s13  }
  0x4b   : > { %s1394_s5 = sshll.u32 (%p1990_p13), %s1845_s23, 5  ;;  %s1343_s25 = sshll.u32 (%p1990_p13), %s385_s11, 6 }
  0x4c   : > { %s390_s26 = sadd.s32 (%p1990_p13), %s1841_s22, %s1394_s5  ;;  %s387_s0 = scalar_lea.vmem (%p1990_p13), [#allocation5], %s1343_s25 }
  0x4d   : > { %s1346_s27 = sshll.u32 (%p1990_p13), %s390_s26, 2 }
  0x4e   : > { %s2059_s6 = scalar_lea.vmem (%p1990_p13), %s2290_s2, %s1346_s27 }
  0x4f   : > { %v408_v32 = vld [vmem:[%s2059_s6] sm:$0xf] (%p1990_p13)  ;;  %v410_v33 = vld [vmem:[%s2059_s6 + $0x8] sm:$0xf] (%p1990_p13)  ;;  %v412_v34 = vld [vmem:[%s2059_s6 + $0x10] sm:$0xf] (%p1990_p13) }
  0x50   : > { %409 = vst [vmem:[%s387_s0] sm:$0xf] (%p1990_p13), %v408_v32  ;;  %411 = vst [vmem:[%s387_s0 + $0x4] sm:$0xf] (%p1990_p13), %v410_v33  ;;  %v414_v35 = vld [vmem:[%s2059_s6 + $0x18] sm:$0xf] (%p1990_p13) }
  0x51   : > { %413 = vst [vmem:[%s387_s0 + $0x8] sm:$0xf] %v412_v34  ;;  %v416_v36 = vld [vmem:[%s2059_s6 + $0x20] sm:$0xf]  ;;  %v418_v37 = vld [vmem:[%s2059_s6 + $0x28] sm:$0xf] }
  0x52   : > { %415 = vst [vmem:[%s387_s0 + $0xc] sm:$0xf] %v414_v35  ;;  %417 = vst [vmem:[%s387_s0 + $0x10] sm:$0xf] %v416_v36  ;;  %v420_v38 = vld [vmem:[%s2059_s6 + $0x30] sm:$0xf] }
  0x53   : > { %419 = vst [vmem:[%s387_s0 + $0x14] sm:$0xf] %v418_v37  ;;  %v422_v39 = vld [vmem:[%s2059_s6 + $0x38] sm:$0xf]  ;;  %v424_v40 = vld [vmem:[%s2059_s6 + $0x40] sm:$0xf] }
  0x54   : > { %421 = vst [vmem:[%s387_s0 + $0x18] sm:$0xf] %v420_v38  ;;  %423 = vst [vmem:[%s387_s0 + $0x1c] sm:$0xf] %v422_v39  ;;  %v426_v41 = vld [vmem:[%s2059_s6 + $0x48] sm:$0xf] }
  0x55   : > { %425 = vst [vmem:[%s387_s0 + $0x20] sm:$0xf] %v424_v40  ;;  %v428_v42 = vld [vmem:[%s2059_s6 + $0x50] sm:$0xf]  ;;  %v430_v43 = vld [vmem:[%s2059_s6 + $0x58] sm:$0xf] }
  0x56   : > { %427 = vst [vmem:[%s387_s0 + $0x24] sm:$0xf] %v426_v41  ;;  %429 = vst [vmem:[%s387_s0 + $0x28] sm:$0xf] %v428_v42  ;;  %v432_v44 = vld [vmem:[%s2059_s6 + $0x60] sm:$0xf] }
  0x57   : > { %431 = vst [vmem:[%s387_s0 + $0x2c] sm:$0xf] %v430_v43  ;;  %v434_v45 = vld [vmem:[%s2059_s6 + $0x68] sm:$0xf]  ;;  %v436_v46 = vld [vmem:[%s2059_s6 + $0x70] sm:$0xf] }
  0x58   : > { %433 = vst [vmem:[%s387_s0 + $0x30] sm:$0xf] %v432_v44  ;;  %435 = vst [vmem:[%s387_s0 + $0x34] sm:$0xf] %v434_v45  ;;  %v438_v47 = vld [vmem:[%s2059_s6 + $0x78] sm:$0xf] }
  0x59   : > { %437 = vst [vmem:[%s387_s0 + $0x38] sm:$0xf] %v436_v46  ;;  %439 = vst [vmem:[%s387_s0 + $0x3c] sm:$0xf] %v438_v47 }
  0x5a PF: > { %p1347_p2 = scmp.ge.s32.totalorder %s1849_s24, 1  ;;  %p493_p3 = scmp.lt.s32.totalorder %s1849_s24, 9 }
  0x5c   : > { %p494_p4 = pnand %p1347_p2, %p493_p3 }
  0x5d   : > { %s500_s19 = sand.u32 (!%p494_p4), 1, %s1817_s16   ;;  %s507_s10 = sand.u32 (!%p494_p4), 1, %s1809_s14  }
  0x5e   : > { %497 = sbr.rel (%p494_p4) target bundleno = 435 (0x1b3), region = 143  ;;  %s1348_s8 = sshll.u32 (!%p494_p4), %s500_s19, 6 }
  0x5f   : > { %s1349_s11 = sshll.u32 (!%p494_p4), %s507_s10, 6  ;;  %s514_s5 = sand.u32 (!%p494_p4), 1, %s1801_s12  }
  0x60   : > { %s1350_s25 = sshll.u32 (!%p494_p4), %s514_s5, 6  ;;  %s2082_s26 = scalar_lea.vmem (!%p494_p4), [#allocation3], %s1348_s8 }
  0x61   : > { %s2084_s27 = scalar_lea.vmem (!%p494_p4), [#allocation4], %s1349_s11  ;;  %s2086_s29 = scalar_lea.vmem (!%p494_p4), [#allocation5], %s1350_s25 }
  0x62   : > { %s2088_s30 = scalar_lea.vmem (!%p494_p4), [#allocation6], %s1350_s25  ;;  %p1352_p5 = scmp.ne.s32.totalorder (!%p494_p4), %s1825_s18, 0 }
  0x65   : > { %552 = sbr.rel (%p1352_p5) target bundleno = 110 (0x6e), region = 159  ;;  %v1851_v48 = vmov (!%p1352_p5), 0.0  }
  0x66   : > { %553 = vst [vmem:[#allocation2] sm:$0xff] (!%p1352_p5), %v1851_v48  ;;  %554 = vst [vmem:[#allocation2 + $0x8] sm:$0xff] (!%p1352_p5), %v1851_v48 }
  0x67   : > { %555 = vst [vmem:[#allocation2 + $0x10] sm:$0xff] (!%p1352_p5), %v1851_v48  ;;  %556 = vst [vmem:[#allocation2 + $0x18] sm:$0xff] (!%p1352_p5), %v1851_v48 }
  0x68   : > { %557 = vst [vmem:[#allocation2 + $0x20] sm:$0xff] (!%p1352_p5), %v1851_v48  ;;  %558 = vst [vmem:[#allocation2 + $0x28] sm:$0xff] (!%p1352_p5), %v1851_v48 }
  0x69   : > { %559 = vst [vmem:[#allocation2 + $0x30] sm:$0xff] (!%p1352_p5), %v1851_v48  ;;  %560 = vst [vmem:[#allocation2 + $0x38] sm:$0xff] (!%p1352_p5), %v1851_v48 }
  0x6a   : > { %561 = vst [vmem:[#allocation2 + $0x40] sm:$0xff] (!%p1352_p5), %v1851_v48  ;;  %562 = vst [vmem:[#allocation2 + $0x48] sm:$0xff] (!%p1352_p5), %v1851_v48 }
  0x6b   : > { %563 = vst [vmem:[#allocation2 + $0x50] sm:$0xff] (!%p1352_p5), %v1851_v48  ;;  %564 = vst [vmem:[#allocation2 + $0x58] sm:$0xff] (!%p1352_p5), %v1851_v48 }
  0x6c   : > { %565 = vst [vmem:[#allocation2 + $0x60] sm:$0xff] %v1851_v48  ;;  %566 = vst [vmem:[#allocation2 + $0x68] sm:$0xff] %v1851_v48 }
  0x6d   : > { %567 = vst [vmem:[#allocation2 + $0x70] sm:$0xff] %v1851_v48  ;;  %568 = vst [vmem:[#allocation2 + $0x78] sm:$0xff] %v1851_v48 }
  0x6e PF: > { %v1667_v49 = vld [vmem:[%s2084_s27] sm:$0xff]   ;;  %v1668_v50 = vld [vmem:[%s2084_s27 + $0x8] sm:$0xff]   ;;  %v1669_v51 = vld [vmem:[%s2084_s27 + $0x10] sm:$0xff]   ;;  %p1369_p6 = scmp.ne.s32.totalorder %s1825_s18, 1 }
  0x6f   : > { %1514 = vmatprep.subr.bf16.mxu0 %v1667_v49  ;;  %1546 = vmatprep.subr.bf16.mxu1 %v1667_v49  ;;  %v1670_v52 = vld [vmem:[%s2084_s27 + $0x18] sm:$0xff]   ;;  %v1675_v53 = vld [vmem:[%s2082_s26] sm:$0xff]   ;;  %v1672_v56 = vld [vmem:[%s2084_s27 + $0x28] sm:$0xff]  }
  0x70   : > { %1515 = vmatpush3.bf16.msra.mxu0 %v1667_v49  ;;  %1554 = vmatpush3.bf16.msra.mxu1 %v1667_v49  ;;  %v1676_v54 = vld [vmem:[%s2082_s26 + $0x20] sm:$0xff]   ;;  %v1673_v57 = vld [vmem:[%s2084_s27 + $0x30] sm:$0xff]   ;;  %v1674_v58 = vld [vmem:[%s2084_s27 + $0x38] sm:$0xff]  }
  0x71   : > { %1516 = vmatprep.subr.bf16.mxu0 %v1668_v50  ;;  %1547 = vmatprep.subr.bf16.mxu1 %v1668_v50  ;;  %v1671_v55 = vld [vmem:[%s2084_s27 + $0x20] sm:$0xff]   ;;  %v1677_v59 = vld [vmem:[%s2082_s26 + $0x8] sm:$0xff]   ;;  %v1679_v61 = vld [vmem:[%s2082_s26 + $0x10] sm:$0xff]  }
  0x72   : > { %1530 = vmatprep.mubr.bf16.mxu0 %v1675_v53  ;;  %1538 = vmatprep.mubr.bf16.mxu1 %v1676_v54  ;;  %v1678_v60 = vld [vmem:[%s2082_s26 + $0x28] sm:$0xff]   ;;  %v1680_v62 = vld [vmem:[%s2082_s26 + $0x30] sm:$0xff]   ;;  %v1681_v63 = vld [vmem:[%s2082_s26 + $0x18] sm:$0xff]  }
  0x73   : > { %v1682_v0 = vld [vmem:[%s2082_s26 + $0x38] sm:$0xff]   ;;  %v571_v1 = vld [vmem:[#allocation2 + $0x10] sm:$0xff]  ;;  %v569_v3 = vld [vmem:[#allocation2] sm:$0xff] }
  0x74   : > { %1517 = vmatpush3.bf16.msra.mxu0 %v1668_v50  ;;  %1555 = vmatpush3.bf16.msra.mxu1 %v1668_v50  ;;  %v579_v2 = vld [vmem:[#allocation2 + $0x50] sm:$0xff]  ;;  %v577_v4 = vld [vmem:[#allocation2 + $0x40] sm:$0xff]  ;;  %v572_v7 = vld [vmem:[#allocation2 + $0x18] sm:$0xff] }
  0x75   : > { %1518 = vmatprep.subr.bf16.mxu0 %v1669_v51  ;;  %1548 = vmatprep.subr.bf16.mxu1 %v1669_v51  ;;  %v580_v8 = vld [vmem:[#allocation2 + $0x58] sm:$0xff]  ;;  %v570_v13 = vld [vmem:[#allocation2 + $0x8] sm:$0xff]  ;;  %v575_v25 = vld [vmem:[#allocation2 + $0x30] sm:$0xff] }
  0x76   : > { %v578_v14 = vld [vmem:[#allocation2 + $0x48] sm:$0xff]  ;;  %v583_v26 = vld [vmem:[#allocation2 + $0x70] sm:$0xff]  ;;  %v573_v27 = vld [vmem:[#allocation2 + $0x20] sm:$0xff] }
  0x77   : > { %v581_v28 = vld [vmem:[#allocation2 + $0x60] sm:$0xff]  ;;  %v576_v31 = vld [vmem:[#allocation2 + $0x38] sm:$0xff]  ;;  %v574_v37 = vld [vmem:[#allocation2 + $0x28] sm:$0xff] }
  0x78   : > { %1519 = vmatpush3.bf16.msra.mxu0 %v1669_v51  ;;  %1556 = vmatpush3.bf16.msra.mxu1 %v1669_v51  ;;  %v584_v32 = vld [vmem:[#allocation2 + $0x78] sm:$0xff]  ;;  %v582_v38 = vld [vmem:[#allocation2 + $0x68] sm:$0xff]  ;;  %v2109_v49 = vld [vmem:[%s2086_s29] sm:$0xff] (!%p1369_p6)  }
  0x79   : > { %1520 = vmatprep.subr.bf16.mxu0 %v1670_v52  ;;  %1549 = vmatprep.subr.bf16.mxu1 %v1670_v52  ;;  %v1414_v50 = vunpack.c.l.bf16 (!%p1369_p6), %v2109_v49  ;;  %v1415_v51 = vunpack.c.h.bf16 (!%p1369_p6), %v2109_v49 }
  0x7c   : > { %1521 = vmatpush3.bf16.msra.mxu0 %v1670_v52  ;;  %1557 = vmatpush3.bf16.msra.mxu1 %v1670_v52  ;;  %v2114_v52 = vld [vmem:[%s2086_s29 + $0x8] sm:$0xff] (!%p1369_p6)  }
  0x7d   : > { %1522 = vmatprep.subr.bf16.mxu0 %v1671_v55  ;;  %1550 = vmatprep.subr.bf16.mxu1 %v1671_v55  ;;  %v1418_v53 = vunpack.c.l.bf16 (!%p1369_p6), %v2114_v52  ;;  %v1419_v54 = vunpack.c.h.bf16 (!%p1369_p6), %v2114_v52 }
  0x80   : > { %1523 = vmatpush3.bf16.msra.mxu0 %v1671_v55  ;;  %1558 = vmatpush3.bf16.msra.mxu1 %v1671_v55  ;;  %v2119_v55 = vld [vmem:[%s2086_s29 + $0x10] sm:$0xff] (!%p1369_p6)  }
  0x81   : > { %1524 = vmatprep.subr.bf16.mxu0 %v1672_v56  ;;  %1551 = vmatprep.subr.bf16.mxu1 %v1672_v56 }
  0x84   : > { %1525 = vmatpush3.bf16.msra.mxu0 %v1672_v56  ;;  %1559 = vmatpush3.bf16.msra.mxu1 %v1672_v56  ;;  %v878_v56 = vsub.f32 (!%p1369_p6), 0.0, %v1414_v50 }
  0x85   : > { %1526 = vmatprep.subr.bf16.mxu0 %v1673_v57  ;;  %1552 = vmatprep.subr.bf16.mxu1 %v1673_v57 }
  0x88   : > { %1527 = vmatpush3.bf16.msra.mxu0 %v1673_v57  ;;  %1560 = vmatpush3.bf16.msra.mxu1 %v1673_v57  ;;  %v879_v57 = vsub.f32 (!%p1369_p6), 0.0, %v1415_v51 }
  0x89   : > { %1528 = vmatprep.subr.bf16.mxu0 %v1674_v58  ;;  %1553 = vmatprep.subr.bf16.mxu1 %v1674_v58 }
  0x8c   : > { %1529 = vmatpush3.bf16.msra.mxu0 %v1674_v58  ;;  %1561 = vmatpush3.bf16.msra.mxu1 %v1674_v58  ;;  %v1422_v58 = vunpack.c.l.bf16 (!%p1369_p6), %v2119_v55 }
  0x8f   : > { %1531 = vmatmul.mubr.bf16.vlgmr.msra.gmra.mrb[0].mxu0 %v1677_v59  ;;  %1539 = vmatmul.mubr.bf16.vlgmr.msra.gmra.mrb[0].mxu1 %v1678_v60  ;;  %v1423_v59 = vunpack.c.h.bf16 (!%p1369_p6), %v2119_v55  ;;  %v2128_v60 = vld [vmem:[%s2086_s29 + $0x18] sm:$0xff] (!%p1369_p6)  }
  0x90   : > { %1534 = vmatprep.mubr.bf16.mxu0 %v1679_v61  ;;  %1542 = vmatprep.mubr.bf16.mxu1 %v1680_v62  ;;  %v880_v61 = vsub.f32 (!%p1369_p6), 0.0, %v1418_v53  ;;  %v881_v62 = vsub.f32 (!%p1369_p6), 0.0, %v1419_v54 }
  0x97   : > { %1535 = vmatmul.mubr.bf16.gmra.mrb[4].mxu0 %v1681_v63  ;;  %1543 = vmatmul.mubr.bf16.gmra.mrb[4].mxu1 %v1682_v0  ;;  %v1426_v63 = vunpack.c.l.bf16 (!%p1369_p6), %v2128_v60  ;;  %v1427_v0 = vunpack.c.h.bf16 (!%p1369_p6), %v2128_v60 }
 0x162   : > { %v1532_v5 = vpop.f32.mrb[0].mxu0  ;;  %v1540_v6 = vpop.f32.mrb[0].mxu1 }
 0x163   : > { %v812_v9 = vadd.f32 %v1532_v5, %v571_v1  ;;  %v820_v10 = vadd.f32 %v1540_v6, %v579_v2  ;;  %v747_v11 = vpop.f32.mrb[1].mxu0  ;;  %v779_v12 = vpop.f32.mrb[1].mxu1  ;;  %v2137_v1 = vld [vmem:[%s2086_s29 + $0x20] sm:$0xff] (!%p1369_p6)   ;;  %v894_v2 = vmul.f32 (!%p1369_p6), 1.442695, %v878_v56  ;;  %v883_v5 = vsub.f32 (!%p1369_p6), 0.0, %v1423_v59 }
 0x164   : > { %v810_v15 = vadd.f32 %v747_v11, %v569_v3  ;;  %v818_v16 = vadd.f32 %v779_v12, %v577_v4  ;;  %v1533_v17 = vpop.f32.mrb[2].mxu0  ;;  %v1541_v18 = vpop.f32.mrb[2].mxu1  ;;  %v896_v3 = vmul.f32 (!%p1369_p6), 1.442695, %v879_v57  ;;  %v882_v4 = vsub.f32 (!%p1369_p6), 0.0, %v1422_v58  ;;  %v2149_v12 = vld [vmem:[%s2086_s29 + $0x28] sm:$0xff] (!%p1369_p6)  }
 0x165   : > { %828 = vst [vmem:[#allocation2 + $0x10] sm:$0xff] %v812_v9  ;;  %836 = vst [vmem:[#allocation2 + $0x50] sm:$0xff] %v820_v10  ;;  %v813_v19 = vadd.f32 %v1533_v17, %v572_v7  ;;  %v821_v20 = vadd.f32 %v1541_v18, %v580_v8  ;;  %v750_v21 = vpop.f32.mrb[3].mxu0  ;;  %v782_v22 = vpop.f32.mrb[3].mxu1  ;;  %v898_v6 = vmul.f32 (!%p1369_p6), 1.442695, %v880_v61  ;;  %1683 = vpow2.f32 (!%p1369_p6), %v894_v2 }
 0x166   : > { %826 = vst [vmem:[#allocation2] sm:$0xff] %v810_v15  ;;  %834 = vst [vmem:[#allocation2 + $0x40] sm:$0xff] %v818_v16  ;;  %v811_v23 = vadd.f32 %v750_v21, %v570_v13  ;;  %v819_v24 = vadd.f32 %v782_v22, %v578_v14  ;;  %v900_v7 = vmul.f32 (!%p1369_p6), 1.442695, %v881_v62  ;;  %v884_v8 = vsub.f32 (!%p1369_p6), 0.0, %v1426_v63  ;;  %v2153_v16 = vld [vmem:[%s2086_s29 + $0x30] sm:$0xff] (!%p1369_p6)  }
 0x167   : > { %829 = vst [vmem:[#allocation2 + $0x18] sm:$0xff] %v813_v19  ;;  %837 = vst [vmem:[#allocation2 + $0x58] sm:$0xff] %v821_v20  ;;  %v885_v9 = vsub.f32 (!%p1369_p6), 0.0, %v1427_v0  ;;  %v902_v10 = vmul.f32 (!%p1369_p6), 1.442695, %v882_v4  ;;  %v1430_v11 = vunpack.c.l.bf16 (!%p1369_p6), %v2137_v1  ;;  %1685 = vpow2.f32 (!%p1369_p6), %v896_v3 }
 0x168   : > { %827 = vst [vmem:[#allocation2 + $0x8] sm:$0xff] %v811_v23  ;;  %835 = vst [vmem:[#allocation2 + $0x48] sm:$0xff] %v819_v24  ;;  %v904_v13 = vmul.f32 (!%p1369_p6), 1.442695, %v883_v5  ;;  %v906_v14 = vmul.f32 (!%p1369_p6), 1.442695, %v884_v8  ;;  %v1431_v15 = vunpack.c.h.bf16 (!%p1369_p6), %v2137_v1  ;;  %1687 = vpow2.f32 (!%p1369_p6), %v898_v6 }
 0x169   : > { %v886_v17 = vsub.f32 (!%p1369_p6), 0.0, %v1430_v11  ;;  %v1434_v18 = vunpack.c.l.bf16 (!%p1369_p6), %v2149_v12  ;;  %v1435_v19 = vunpack.c.h.bf16 (!%p1369_p6), %v2149_v12  ;;  %1689 = vpow2.f32 (!%p1369_p6), %v900_v7 }
 0x16a   : > { %v1536_v29 = vpop.f32.mrb[4].mxu0  ;;  %v1544_v30 = vpop.f32.mrb[4].mxu1  ;;  %845 = sbr.rel (%p1369_p6) target bundleno = 418 (0x1a2), region = 163  ;;  %v908_v20 = vmul.f32 (!%p1369_p6), 1.442695, %v885_v9  ;;  %v887_v21 = vsub.f32 (!%p1369_p6), 0.0, %v1431_v15  ;;  %v1438_v22 = vunpack.c.l.bf16 (!%p1369_p6), %v2153_v16  ;;  %1691 = vpow2.f32 (!%p1369_p6), %v902_v10 }
 0x16b   : > { %v816_v33 = vadd.f32 %v1536_v29, %v575_v25  ;;  %v824_v34 = vadd.f32 %v1544_v30, %v583_v26  ;;  %v763_v35 = vpop.f32.mrb[5].mxu0  ;;  %v795_v36 = vpop.f32.mrb[5].mxu1  ;;  %v910_v23 = vmul.f32 (!%p1369_p6), 1.442695, %v886_v17  ;;  %v888_v24 = vsub.f32 (!%p1369_p6), 0.0, %v1434_v18 }
 0x16c   : > { %v814_v39 = vadd.f32 %v763_v35, %v573_v27  ;;  %v822_v40 = vadd.f32 %v795_v36, %v581_v28  ;;  %v1537_v41 = vpop.f32.mrb[6].mxu0  ;;  %v1545_v42 = vpop.f32.mrb[6].mxu1  ;;  %v889_v25 = vsub.f32 (!%p1369_p6), 0.0, %v1435_v19  ;;  %1693 = vpow2.f32 (!%p1369_p6), %v904_v13  ;;  %v2169_v36 = vld [vmem:[%s2086_s29 + $0x38] sm:$0xff] (!%p1369_p6)  }
 0x16d   : > { %832 = vst [vmem:[#allocation2 + $0x30] sm:$0xff] %v816_v33  ;;  %840 = vst [vmem:[#allocation2 + $0x70] sm:$0xff] %v824_v34  ;;  %v817_v43 = vadd.f32 %v1537_v41, %v576_v31  ;;  %v825_v44 = vadd.f32 %v1545_v42, %v584_v32  ;;  %v766_v45 = vpop.f32.mrb[7].mxu0  ;;  %v798_v46 = vpop.f32.mrb[7].mxu1  ;;  %v912_v26 = vmul.f32 (!%p1369_p6), 1.442695, %v887_v21  ;;  %1695 = vpow2.f32 (!%p1369_p6), %v906_v14 }
 0x16e   : > { %830 = vst [vmem:[#allocation2 + $0x20] sm:$0xff] %v814_v39  ;;  %838 = vst [vmem:[#allocation2 + $0x60] sm:$0xff] %v822_v40  ;;  %v815_v47 = vadd.f32 %v766_v45, %v574_v37  ;;  %v823_v48 = vadd.f32 %v798_v46, %v582_v38  ;;  %v890_v27 = vsub.f32 (!%p1369_p6), 0.0, %v1438_v22  ;;  %v914_v28 = vmul.f32 (!%p1369_p6), 1.442695, %v888_v24 }
 0x16f   : > { %833 = vst [vmem:[#allocation2 + $0x38] sm:$0xff] %v817_v43  ;;  %841 = vst [vmem:[#allocation2 + $0x78] sm:$0xff] %v825_v44  ;;  %1697 = vpow2.f32 (!%p1369_p6), %v908_v20  ;;  %v916_v29 = vmul.f32 (!%p1369_p6), 1.442695, %v889_v25  ;;  %v1684_v31 = vpop.eup (!%p1369_p6), %1683  ;;  %v1439_v39 = vunpack.c.h.bf16 (!%p1369_p6), %v2153_v16  ;;  %v1442_v44 = vunpack.c.l.bf16 (!%p1369_p6), %v2169_v36  ;;  %v990_v20 = vld [vmem:[#allocation2] sm:$0xff] (!%p1369_p6)  ;;  %v991_v25 = vld [vmem:[#allocation2 + $0x8] sm:$0xff] (!%p1369_p6) }
 0x170   : > { %831 = vst [vmem:[#allocation2 + $0x28] sm:$0xff] %v815_v47  ;;  %839 = vst [vmem:[#allocation2 + $0x68] sm:$0xff] %v823_v48  ;;  %1699 = vpow2.f32 (!%p1369_p6), %v910_v23  ;;  %v918_v30 = vmul.f32 (!%p1369_p6), 1.442695, %v890_v27  ;;  %v926_v33 = vadd.f32 (!%p1369_p6), 1.0, %v1684_v31  ;;  %v1443_v47 = vunpack.c.h.bf16 (!%p1369_p6), %v2169_v36 }
 0x171   : > { %1701 = vpow2.f32 %v912_v26  ;;  %v1686_v32 = vpop.eup %1685  ;;  %v891_v57 = vsub.f32 0.0, %v1439_v39  ;;  %v892_v4 = vsub.f32 0.0, %v1442_v44 }
 0x172   : > { %1703 = vpow2.f32 %v914_v28  ;;  %v1688_v34 = vpop.eup %1687  ;;  %v927_v35 = vadd.f32 1.0, %v1686_v32  ;;  %v893_v7 = vsub.f32 0.0, %v1443_v47 }
 0x173   : > { %1705 = vpow2.f32 %v916_v29  ;;  %v1690_v37 = vpop.eup %1689  ;;  %v928_v38 = vadd.f32 1.0, %v1688_v34  ;;  %v920_v10 = vmul.f32 1.442695, %v891_v57  ;;  %v922_v21 = vmul.f32 1.442695, %v892_v4  ;;  %v992_v29 = vld [vmem:[#allocation2 + $0x10] sm:$0xff] }
 0x174   : > { %1707 = vpow2.f32 %v918_v30  ;;  %v1692_v40 = vpop.eup %1691  ;;  %v929_v41 = vadd.f32 1.0, %v1690_v37  ;;  %v924_v26 = vmul.f32 1.442695, %v893_v7  ;;  %v999_v4 = vld [vmem:[#allocation2 + $0x48] sm:$0xff] }
 0x175   : > { %1709 = vrcp.f32 %v926_v33  ;;  %v930_v43 = vadd.f32 1.0, %v1692_v40  ;;  %v993_v33 = vld [vmem:[#allocation2 + $0x18] sm:$0xff]  ;;  %v994_v37 = vld [vmem:[#allocation2 + $0x20] sm:$0xff] }
 0x176   : > { %1711 = vrcp.f32 %v927_v35  ;;  %v1694_v42 = vpop.eup %1693 }
 0x177   : > { %1713 = vrcp.f32 %v928_v38  ;;  %v1696_v45 = vpop.eup %1695  ;;  %v931_v46 = vadd.f32 1.0, %v1694_v42 }
 0x178   : > { %1715 = vrcp.f32 %v929_v41  ;;  %v932_v56 = vadd.f32 1.0, %v1696_v45 }
 0x179   : > { %v1698_v48 = vpop.eup %1697  ;;  %1717 = vrcp.f32 %v930_v43 }
 0x17a   : > { %v1700_v61 = vpop.eup %1699  ;;  %1719 = vrcp.f32 %v931_v46  ;;  %v933_v62 = vadd.f32 1.0, %v1698_v48  ;;  %v996_v46 = vld [vmem:[#allocation2 + $0x30] sm:$0xff] }
 0x17b   : > { %v1702_v2 = vpop.eup %1701  ;;  %1721 = vrcp.f32 %v932_v56  ;;  %v934_v3 = vadd.f32 1.0, %v1700_v61  ;;  %v997_v56 = vld [vmem:[#allocation2 + $0x38] sm:$0xff] }
 0x17c   : > { %v1704_v5 = vpop.eup %1703  ;;  %1723 = vrcp.f32 %v933_v62  ;;  %v935_v6 = vadd.f32 1.0, %v1702_v2  ;;  %v998_v2 = vld [vmem:[#allocation2 + $0x40] sm:$0xff] }
 0x17d   : > { %v1706_v8 = vpop.eup %1705  ;;  %1725 = vrcp.f32 %v934_v3  ;;  %v936_v9 = vadd.f32 1.0, %v1704_v5 }
 0x17e   : > { %v1708_v13 = vpop.eup %1707  ;;  %1727 = vrcp.f32 %v935_v6  ;;  %v937_v14 = vadd.f32 1.0, %v1706_v8  ;;  %v1000_v8 = vld [vmem:[#allocation2 + $0x50] sm:$0xff] }
 0x17f   : > { %v1710_v17 = vpop.eup %1709  ;;  %1729 = vrcp.f32 %v936_v9  ;;  %v938_v41 = vadd.f32 1.0, %v1708_v13 }
 0x180   : > { %v1712_v23 = vpop.eup %1711  ;;  %v974_v24 = vmul.f32 %v1710_v17, %v1414_v50  ;;  %1731 = vrcp.f32 %v937_v14 }
 0x181   : > { %v1714_v27 = vpop.eup %1713  ;;  %v975_v28 = vmul.f32 %v1712_v23, %v1415_v51  ;;  %1733 = vpow2.f32 %v920_v10  ;;  %v995_v51 = vld [vmem:[#allocation2 + $0x28] sm:$0xff]  ;;  %v1001_v10 = vld [vmem:[#allocation2 + $0x58] sm:$0xff] }
 0x182   : > { %v1716_v30 = vpop.eup %1715  ;;  %v1006_v31 = vmul.f32 %v990_v20, %v974_v24  ;;  %v976_v32 = vmul.f32 %v1714_v27, %v1418_v53  ;;  %1735 = vpow2.f32 %v922_v21 }
 0x183   : > { %v1718_v34 = vpop.eup %1717  ;;  %v1007_v35 = vmul.f32 %v991_v25, %v975_v28  ;;  %v977_v50 = vmul.f32 %v1716_v30, %v1419_v54  ;;  %1737 = vpow2.f32 %v924_v26 }
 0x184   : > { %v1720_v38 = vpop.eup %1719  ;;  %v1008_v40 = vmul.f32 %v992_v29, %v976_v32  ;;  %v978_v49 = vmul.f32 %v1718_v34, %v1422_v58  ;;  %1739 = vrcp.f32 %v938_v41  ;;  %v1003_v29 = vld [vmem:[#allocation2 + $0x68] sm:$0xff] }
 0x185   : > { %v1722_v42 = vpop.eup %1721  ;;  %v1447_v43 = vpack.c.bf16 %v1007_v35, %v1006_v31  ;;  %v1009_v53 = vmul.f32 %v993_v33, %v977_v50  ;;  %v979_v45 = vmul.f32 %v1720_v38, %v1423_v59  ;;  %v1004_v33 = vld [vmem:[#allocation2 + $0x70] sm:$0xff] }
 0x186   : > { %v1724_v52 = vpop.eup %1723  ;;  %v1010_v54 = vmul.f32 %v994_v37, %v978_v49  ;;  %v980_v48 = vmul.f32 %v1722_v42, %v1426_v63  ;;  %v1005_v37 = vld [vmem:[#allocation2 + $0x78] sm:$0xff] }
 0x187   : > { %v1726_v57 = vpop.eup %1725  ;;  %1448 = vst [vmem:[%s2088_s30] sm:$0xff] %v1447_v43   ;;  %v1452_v58 = vpack.c.bf16 %v1009_v53, %v1008_v40  ;;  %v1011_v61 = vmul.f32 %v995_v51, %v979_v45  ;;  %v981_v62 = vmul.f32 %v1724_v52, %v1427_v0 }
 0x188   : > { %v1728_v3 = vpop.eup %1727  ;;  %v1012_v55 = vmul.f32 %v996_v46, %v980_v48  ;;  %v982_v59 = vmul.f32 %v1726_v57, %v1430_v11 }
 0x189   : > { %v1730_v5 = vpop.eup %1729  ;;  %1491 = vst [vmem:[%s2088_s30 + $0x8] sm:$0xff] %v1452_v58   ;;  %v1457_v63 = vpack.c.bf16 %v1011_v61, %v1010_v54  ;;  %v1013_v6 = vmul.f32 %v997_v56, %v981_v62  ;;  %v983_v7 = vmul.f32 %v1728_v3, %v1431_v15 }
 0x18a   : > { %v1732_v60 = vpop.eup %1731  ;;  %v1014_v0 = vmul.f32 %v998_v2, %v982_v59  ;;  %v984_v9 = vmul.f32 %v1730_v5, %v1434_v18 }
 0x18b   : > { %v1734_v13 = vpop.eup %1733  ;;  %1492 = vst [vmem:[%s2088_s30 + $0x10] sm:$0xff] %v1457_v63   ;;  %v1462_v11 = vpack.c.bf16 %v1013_v6, %v1012_v55  ;;  %v1015_v14 = vmul.f32 %v999_v4, %v983_v7  ;;  %v985_v17 = vmul.f32 %v1732_v60, %v1435_v19  ;;  %v1002_v19 = vld [vmem:[#allocation2 + $0x60] sm:$0xff] }
 0x18c   : > { %v1016_v20 = vmul.f32 %v1000_v8, %v984_v9  ;;  %v939_v21 = vadd.f32 1.0, %v1734_v13  ;;  %v1736_v1 = vpop.eup %1735 }
 0x18d   : > { %1493 = vst [vmem:[%s2088_s30 + $0x18] sm:$0xff] %v1462_v11   ;;  %v1467_v15 = vpack.c.bf16 %v1015_v14, %v1014_v0  ;;  %v1017_v23 = vmul.f32 %v1001_v10, %v985_v17  ;;  %v1738_v24 = vpop.eup %1737  ;;  %v940_v25 = vadd.f32 1.0, %v1736_v1 }
 0x18e   : > { %1741 = vrcp.f32 %v939_v21  ;;  %v941_v26 = vadd.f32 1.0, %v1738_v24  ;;  %v1740_v27 = vpop.eup %1739 }
 0x18f   : > { %1494 = vst [vmem:[%s2088_s30 + $0x20] sm:$0xff] %v1467_v15   ;;  %v1472_v18 = vpack.c.bf16 %v1017_v23, %v1016_v20  ;;  %1743 = vrcp.f32 %v940_v25  ;;  %v986_v12 = vmul.f32 %v1740_v27, %v1438_v22 }
 0x190   : > { %1745 = vrcp.f32 %v941_v26 }
 0x191   : > { %1495 = vst [vmem:[%s2088_s30 + $0x28] sm:$0xff] %v1472_v18   ;;  %v1018_v31 = vmul.f32 %v1002_v19, %v986_v12 }
 0x198   : > { %v1742_v28 = vpop.eup %1741 }
 0x199   : > { %v987_v30 = vmul.f32 %v1742_v28, %v1439_v39  ;;  %v1744_v32 = vpop.eup %1743 }
 0x19a   : > { %v1746_v34 = vpop.eup %1745  ;;  %v988_v50 = vmul.f32 %v1744_v32, %v1442_v44 }
 0x19b   : > { %v1019_v35 = vmul.f32 %v1003_v29, %v987_v30  ;;  %v989_v22 = vmul.f32 %v1746_v34, %v1443_v47 }
 0x19c   : > { %v1020_v40 = vmul.f32 %v1004_v33, %v988_v50 }
 0x19d   : > { %v1477_v38 = vpack.c.bf16 %v1019_v35, %v1018_v31  ;;  %v1021_v49 = vmul.f32 %v1005_v37, %v989_v22 }
 0x19f   : > { %1496 = vst [vmem:[%s2088_s30 + $0x30] sm:$0xff] %v1477_v38   ;;  %v1482_v51 = vpack.c.bf16 %v1021_v49, %v1020_v40 }
 0x1a1   : > { %1497 = vst [vmem:[%s2088_s30 + $0x38] sm:$0xff] %v1482_v51  }
 0x1a2 PF: > { %1108 = sbr.rel (!%p1994_p0) target bundleno = 435 (0x1b3), region = 167  ;;  %s2305_s12 = sld [smem:[#allocation7_spill]] (%p1994_p0)  ;;  %v1129_v16 = vld [vmem:[%s2088_s30] sm:$0xf] (%p1994_p0)  ;;  %v1131_v36 = vld [vmem:[%s2088_s30 + $0x4] sm:$0xf] (%p1994_p0) }
 0x1a3   : > { %s1411_s14 = sshll.u32 (%p1994_p0), %s1833_s20, 5  ;;  %v1133_v39 = vld [vmem:[%s2088_s30 + $0x8] sm:$0xf] (%p1994_p0)  ;;  %v1135_v44 = vld [vmem:[%s2088_s30 + $0xc] sm:$0xf] (%p1994_p0)  ;;  %s2306_s0 = sld [smem:[#allocation11_spill]] (%p1994_p0) }
 0x1a4   : > { %v1137_v47 = vld [vmem:[%s2088_s30 + $0x10] sm:$0xf] (%p1994_p0)  ;;  %v1139_v41 = vld [vmem:[%s2088_s30 + $0x14] sm:$0xf] (%p1994_p0)  ;;  %v1141_v42 = vld [vmem:[%s2088_s30 + $0x18] sm:$0xf] (%p1994_p0) }
 0x1a5   : > { %v1143_v43 = vld [vmem:[%s2088_s30 + $0x1c] sm:$0xf] (%p1994_p0)  ;;  %v1145_v53 = vld [vmem:[%s2088_s30 + $0x20] sm:$0xf] (%p1994_p0)  ;;  %v1147_v45 = vld [vmem:[%s2088_s30 + $0x24] sm:$0xf] (%p1994_p0) }
 0x1a6   : > { %v1149_v46 = vld [vmem:[%s2088_s30 + $0x28] sm:$0xf] (%p1994_p0)  ;;  %v1151_v52 = vld [vmem:[%s2088_s30 + $0x2c] sm:$0xf] (%p1994_p0)  ;;  %v1153_v54 = vld [vmem:[%s2088_s30 + $0x30] sm:$0xf] (%p1994_p0) }
 0x1a7   : > { %v1155_v48 = vld [vmem:[%s2088_s30 + $0x34] sm:$0xf] (%p1994_p0) }
 0x1a8   : > { %s1111_s16 = sadd.s32 (%p1994_p0), %s2305_s12, %s1411_s14  ;;  %v1157_v56 = vld [vmem:[%s2088_s30 + $0x38] sm:$0xf] (%p1994_p0)  ;;  %v1159_v57 = vld [vmem:[%s2088_s30 + $0x3c] sm:$0xf] (%p1994_p0) }
 0x1a9   : > { %s1389_s18 = sshll.u32 %s1111_s16, 2 }
 0x1aa   : > { %s1113_s19 = scalar_lea.vmem %s2306_s0, %s1389_s18 }
 0x1ab   : > { %1130 = vst [vmem:[%s1113_s19] sm:$0xf] %v1129_v16  ;;  %1132 = vst [vmem:[%s1113_s19 + $0x8] sm:$0xf] %v1131_v36 }
 0x1ac   : > { %1134 = vst [vmem:[%s1113_s19 + $0x10] sm:$0xf] %v1133_v39  ;;  %1136 = vst [vmem:[%s1113_s19 + $0x18] sm:$0xf] %v1135_v44 }
 0x1ad   : > { %1138 = vst [vmem:[%s1113_s19 + $0x20] sm:$0xf] %v1137_v47  ;;  %1140 = vst [vmem:[%s1113_s19 + $0x28] sm:$0xf] %v1139_v41 }
 0x1ae   : > { %1142 = vst [vmem:[%s1113_s19 + $0x30] sm:$0xf] %v1141_v42  ;;  %1144 = vst [vmem:[%s1113_s19 + $0x38] sm:$0xf] %v1143_v43 }
 0x1af   : > { %1146 = vst [vmem:[%s1113_s19 + $0x40] sm:$0xf] %v1145_v53  ;;  %1148 = vst [vmem:[%s1113_s19 + $0x48] sm:$0xf] %v1147_v45 }
 0x1b0   : > { %1150 = vst [vmem:[%s1113_s19 + $0x50] sm:$0xf] %v1149_v46  ;;  %1152 = vst [vmem:[%s1113_s19 + $0x58] sm:$0xf] %v1151_v52 }
 0x1b1   : > { %1154 = vst [vmem:[%s1113_s19 + $0x60] sm:$0xf] %v1153_v54  ;;  %1156 = vst [vmem:[%s1113_s19 + $0x68] sm:$0xf] %v1155_v48 }
 0x1b2   : > { %1158 = vst [vmem:[%s1113_s19 + $0x70] sm:$0xf] %v1157_v56  ;;  %1160 = vst [vmem:[%s1113_s19 + $0x78] sm:$0xf] %v1159_v57 }
 0x1b3 PF: > { %s13_s24 = sadd.s32 1, %s1849_s24   ;;  %s2308_s10 = sld [smem:[#allocation8_spill]] }
 0x1b4   : > { %p2244_p7 = scmp.ge.s32.totalorder %s13_s24, 10   ;;  %s2309_s8 = sld [smem:[#allocation9_spill]] }
 0x1b5   : > { %s2311_s12 = smov %s1805_s13  ;;  %s2312_s13 = smov %s1986_s3 }
 0x1b6   : > { %s2313_s14 = smov %s1813_s15  ;;  %s2314_s15 = smov %s1973_s9 }
 0x1b7   : > { %s2315_s16 = smov %s1821_s17  ;;  %s2316_s17 = smov %s1983_s7 }
 0x1b8   : > { %s2317_s18 = smov %s1837_s21  ;;  %s2318_s19 = smov %s1841_s22 }
 0x1b9   : > { %s2319_s20 = smov %s1845_s23  ;;  %s2320_s21 = smov %s2308_s10 }
 0x1ba   : > { %s2321_s22 = smov %s2309_s8  ;;  %s2322_s23 = smov %s2332_s28 }
 0x1bb   :  { %12 = sbr.rel (!%p2244_p7) target bundleno = 10 (0xa), region = 255 }

// kernel: feed_forward.5
= control target key start
LH: loop header
LB: loop body
LE: loop exit
PB: predicated region body
PF: predicated region fallthrough
CT: control target
= control target key end

     0   :  { %s1581_s0 = inlined_call_operand.vmem [shape: bf16[256,256], index: 0, kind: input, shape index: {}]   ;;  %s1582_s1 = inlined_call_operand.vmem [shape: bf16[256,256], index: 1, kind: input, shape index: {}]   ;;  %s1583_s2 = inlined_call_operand.hbm [shape: f32[256,256], index: 2, kind: output, shape index: {}]  }
   0x1   :  { %1587 = sst [smem:[#allocation12_spill]] %s1583_s2 }
   0x2   :  { %7 = vsyncpa [#allocation6], 0 }
   0x3   :  { %9 = vsyncpa [#allocation6 + $0x1], 0  ;;  %s1263_s9 = smov 0   ;;  %s1265_s10 = smov 0  }
   0x4   :  { %s1267_s11 = smov 0   ;;  %s1269_s12 = smov 0  }
   0x5   :  { %s1271_s13 = smov 0   ;;  %s1273_s14 = smov 0  }
   0x6   :  { %s1275_s15 = smov 0   ;;  %s1277_s16 = smov 0  }
   0x7   :  { %s1279_s17 = smov 0   ;;  %s1281_s18 = smov 0  }
   0x8   :  { %s1283_s19 = smov 0   ;;  %s1285_s20 = smov 0  }
   0x9   :  { %s1287_s21 = smov 0   ;;  %s1289_s22 = smov 0  }
   0xa LB: > { %1588 = sst [smem:[#allocation8_spill]] %s1221_s17  ;;  %s27_s25 = sadd.s32 1, %s1229_s19  ;;  %s1241_s22 = sphi %s1289_s22, %s15_s22   ;;  %s1237_s21 = sphi %s1287_s21, %s1617_s21   ;;  %s1233_s20 = sphi %s1285_s20, %s1616_s20   ;;  %s1229_s19 = sphi %s1283_s19, %s1615_s19   ;;  %s1225_s18 = sphi %s1281_s18, %s1614_s18   ;;  %s1221_s17 = sphi %s1279_s17, %s1613_s17   ;;  %s1217_s16 = sphi %s1277_s16, %s1612_s16   ;;  %s1213_s15 = sphi %s1275_s15, %s1611_s15   ;;  %s1209_s14 = sphi %s1273_s14, %s1610_s14   ;;  %s1205_s13 = sphi %s1271_s13, %s1609_s13   ;;  %s1201_s12 = sphi %s1269_s12, %s1608_s12   ;;  %s1197_s11 = sphi %s1267_s11, %s1607_s11   ;;  %s1193_s10 = sphi %s1265_s10, %s1606_s10   ;;  %s1189_s9 = sphi %s1263_s9, %s1605_s9  }
   0xb   : > { %1589 = sst [smem:[#allocation9_spill]] %s1225_s18  ;;  %s30_s26 = sadd.s32 1, %s1233_s20 }
   0xc   : > { %p28_p0 = scmp.ge.s32.totalorder %s27_s25, 2  ;;  %s34_s27 = sadd.s32 1, %s1237_s21 }
   0xd   : > { %s43_s28 = sadd.s32 1, %s1213_s15  ;;  %p50_p1 = scmp.ne.s32.totalorder %s1213_s15, %s1209_s14 }
   0xe   : > { %s1619_s25 = smov (%p28_p0, %s27_s25), 0  ;;  %s1621_s26 = smov (!%p28_p0, %s30_s26), %s1233_s20 }
   0xf   : > { %1590 = sst [smem:[#allocation10_spill]] %s1619_s25  ;;  %s39_s29 = ssub.s32 %s1229_s19, %s1619_s25 }
  0x10   : > { %p51_p2 = scmp.eq.s32.totalorder %s1241_s22, 0  ;;  %p32_p3 = scmp.ge.s32.totalorder %s1621_s26, 2 }
  0x11   : > { %s71_s30 = sadd.s32 1, %s1205_s13  ;;  %p78_p5 = scmp.ne.s32.totalorder %s1205_s13, %s1201_s12 }
  0x12   : > { %p1348_p4 = por %p51_p2, %p50_p1  ;;  %s1623_s26 = smov (%p32_p3, %s1621_s26), 0 }
  0x13   : > { %1592 = sst [smem:[#allocation11_spill]] %s1623_s26  ;;  %s1625_s27 = smov (!%p32_p3, %s34_s27), %s1237_s21 }
  0x14   : > { %s67_s4 = ssub.s32 %s1233_s20, %s1623_s26  ;;  %p1359_p6 = por %p78_p5, %p51_p2 }
  0x15   : > { %p36_p7 = scmp.ge.s32.totalorder %s1625_s27, 2  ;;  %s68_s6 = sor.u32 %s67_s4, %s39_s29 }
  0x16   : > { %p69_p8 = scmp.eq.s32.totalorder %s68_s6, 0  ;;  %s99_s7 = sadd.s32 1, %s1197_s11 }
  0x17   : > { %s1627_s27 = smov (%p36_p7, %s1625_s27), 0  ;;  %p109_p9 = scmp.ne.s32.totalorder %s1197_s11, %s1193_s10 }
  0x18   : > { %s1367_s8 = scalar_select %p69_p8, %s1205_s13, %s71_s30  }
  0x19   : > { %s38_s24 = ssub.s32 %s1237_s21, %s1627_s27  ;;  %s1594_s25 = sadd.s32 4294967295, %s1241_s22  }
  0x1a   : > { %s40_s23 = sor.u32 %s39_s29, %s38_s24  ;;  %s96_s26 = sor.u32 %s67_s4, %s38_s24 }
  0x1b   : > { %p41_p10 = scmp.eq.s32.totalorder %s40_s23, 0  ;;  %p97_p11 = scmp.eq.s32.totalorder %s96_s26, 0 }
  0x1c   : > { %p110_p12 = scmp.eq.s32.totalorder %s1594_s25, 7  ;;  %p115_p13 = scmp.ne.s32.totalorder %s1193_s10, %s1189_s9 }
  0x1d   : > { %s1378_s2 = scalar_select %p41_p10, %s1213_s15, %s43_s28  }
  0x1e   : > { %s1381_s17 = scalar_select %p97_p11, %s1197_s11, %s99_s7  }
  0x1f   : > { %p1383_p0 = por %p110_p12, %p109_p9  ;;  %s1596_s18 = sadd.s32 4294967294, %s1241_s22  }
  0x20   : > { %p116_p1 = scmp.eq.s32.totalorder %s1596_s18, 7  ;;  %p856_p3 = scmp.ge.s32.totalorder %s1241_s22, 8 }
  0x22   : > { %p1389_p2 = por %p116_p1, %p115_p13  ;;  %132 = sbr.rel (%p856_p3) target bundleno = 73 (0x49), region = 16 }
  0x29   : > { %135 = sbr.rel (!%p1348_p4) target bundleno = 57 (0x39), region = 20  ;;  %s137_s23 = sand.u32 (%p1348_p4), 1, %s1213_s15  }
  0x2a   : > { %s893_s24 = sshll.u32 (%p1348_p4), %s1237_s21, 5  ;;  %s857_s25 = sshll.u32 (%p1348_p4), %s137_s23, 6 }
  0x2b   : > { %s142_s26 = sadd.s32 (%p1348_p4), %s1229_s19, %s893_s24  ;;  %s139_s3 = scalar_lea.vmem (%p1348_p4), [#allocation3], %s857_s25 }
  0x2c   : > { %s860_s28 = sshll.u32 (%p1348_p4), %s142_s26, 2 }
  0x2d   : > { %s1402_s4 = scalar_lea.vmem (%p1348_p4), %s1581_s0, %s860_s28 }
  0x2e   : > { %v160_v0 = vld [vmem:[%s1402_s4] sm:$0xf] (%p1348_p4)  ;;  %v162_v1 = vld [vmem:[%s1402_s4 + $0x8] sm:$0xf] (%p1348_p4)  ;;  %v164_v2 = vld [vmem:[%s1402_s4 + $0x10] sm:$0xf] (%p1348_p4) }
  0x2f   : > { %161 = vst [vmem:[%s139_s3] sm:$0xf] (%p1348_p4), %v160_v0  ;;  %163 = vst [vmem:[%s139_s3 + $0x4] sm:$0xf] (%p1348_p4), %v162_v1  ;;  %v166_v3 = vld [vmem:[%s1402_s4 + $0x18] sm:$0xf] (%p1348_p4) }
  0x30   : > { %165 = vst [vmem:[%s139_s3 + $0x8] sm:$0xf] %v164_v2  ;;  %v168_v4 = vld [vmem:[%s1402_s4 + $0x20] sm:$0xf]  ;;  %v170_v5 = vld [vmem:[%s1402_s4 + $0x28] sm:$0xf] }
  0x31   : > { %167 = vst [vmem:[%s139_s3 + $0xc] sm:$0xf] %v166_v3  ;;  %169 = vst [vmem:[%s139_s3 + $0x10] sm:$0xf] %v168_v4  ;;  %v172_v6 = vld [vmem:[%s1402_s4 + $0x30] sm:$0xf] }
  0x32   : > { %171 = vst [vmem:[%s139_s3 + $0x14] sm:$0xf] %v170_v5  ;;  %v174_v7 = vld [vmem:[%s1402_s4 + $0x38] sm:$0xf]  ;;  %v176_v8 = vld [vmem:[%s1402_s4 + $0x40] sm:$0xf] }
  0x33   : > { %173 = vst [vmem:[%s139_s3 + $0x18] sm:$0xf] %v172_v6  ;;  %175 = vst [vmem:[%s139_s3 + $0x1c] sm:$0xf] %v174_v7  ;;  %v178_v9 = vld [vmem:[%s1402_s4 + $0x48] sm:$0xf] }
  0x34   : > { %177 = vst [vmem:[%s139_s3 + $0x20] sm:$0xf] %v176_v8  ;;  %v180_v10 = vld [vmem:[%s1402_s4 + $0x50] sm:$0xf]  ;;  %v182_v11 = vld [vmem:[%s1402_s4 + $0x58] sm:$0xf] }
  0x35   : > { %179 = vst [vmem:[%s139_s3 + $0x24] sm:$0xf] %v178_v9  ;;  %181 = vst [vmem:[%s139_s3 + $0x28] sm:$0xf] %v180_v10  ;;  %v184_v12 = vld [vmem:[%s1402_s4 + $0x60] sm:$0xf] }
  0x36   : > { %183 = vst [vmem:[%s139_s3 + $0x2c] sm:$0xf] %v182_v11  ;;  %v186_v13 = vld [vmem:[%s1402_s4 + $0x68] sm:$0xf]  ;;  %v188_v14 = vld [vmem:[%s1402_s4 + $0x70] sm:$0xf] }
  0x37   : > { %185 = vst [vmem:[%s139_s3 + $0x30] sm:$0xf] %v184_v12  ;;  %187 = vst [vmem:[%s139_s3 + $0x34] sm:$0xf] %v186_v13  ;;  %v190_v15 = vld [vmem:[%s1402_s4 + $0x78] sm:$0xf] }
  0x38   : > { %189 = vst [vmem:[%s139_s3 + $0x38] sm:$0xf] %v188_v14  ;;  %191 = vst [vmem:[%s139_s3 + $0x3c] sm:$0xf] %v190_v15 }
  0x39 PF: > { %246 = sbr.rel (!%p1359_p6) target bundleno = 73 (0x49), region = 61  ;;  %s248_s7 = sand.u32 (%p1359_p6), 1, %s1205_s13  }
  0x3a   : > { %s894_s23 = sshll.u32 (%p1359_p6), %s1229_s19, 5  ;;  %s861_s24 = sshll.u32 (%p1359_p6), %s248_s7, 6 }
  0x3b   : > { %s253_s25 = sadd.s32 (%p1359_p6), %s1233_s20, %s894_s23  ;;  %s250_s5 = scalar_lea.vmem (%p1359_p6), [#allocation4], %s861_s24 }
  0x3c   : > { %s864_s26 = sshll.u32 (%p1359_p6), %s253_s25, 2 }
  0x3d   : > { %s1428_s18 = scalar_lea.vmem (%p1359_p6), %s1582_s1, %s864_s26 }
  0x3e   : > { %v271_v16 = vld [vmem:[%s1428_s18] sm:$0xf] (%p1359_p6)  ;;  %v273_v17 = vld [vmem:[%s1428_s18 + $0x8] sm:$0xf] (%p1359_p6)  ;;  %v275_v18 = vld [vmem:[%s1428_s18 + $0x10] sm:$0xf] (%p1359_p6) }
  0x3f   : > { %272 = vst [vmem:[%s250_s5] sm:$0xf] (%p1359_p6), %v271_v16  ;;  %274 = vst [vmem:[%s250_s5 + $0x4] sm:$0xf] (%p1359_p6), %v273_v17  ;;  %v277_v19 = vld [vmem:[%s1428_s18 + $0x18] sm:$0xf] (%p1359_p6) }
  0x40   : > { %276 = vst [vmem:[%s250_s5 + $0x8] sm:$0xf] %v275_v18  ;;  %v279_v20 = vld [vmem:[%s1428_s18 + $0x20] sm:$0xf]  ;;  %v281_v21 = vld [vmem:[%s1428_s18 + $0x28] sm:$0xf] }
  0x41   : > { %278 = vst [vmem:[%s250_s5 + $0xc] sm:$0xf] %v277_v19  ;;  %280 = vst [vmem:[%s250_s5 + $0x10] sm:$0xf] %v279_v20  ;;  %v283_v22 = vld [vmem:[%s1428_s18 + $0x30] sm:$0xf] }
  0x42   : > { %282 = vst [vmem:[%s250_s5 + $0x14] sm:$0xf] %v281_v21  ;;  %v285_v23 = vld [vmem:[%s1428_s18 + $0x38] sm:$0xf]  ;;  %v287_v24 = vld [vmem:[%s1428_s18 + $0x40] sm:$0xf] }
  0x43   : > { %284 = vst [vmem:[%s250_s5 + $0x18] sm:$0xf] %v283_v22  ;;  %286 = vst [vmem:[%s250_s5 + $0x1c] sm:$0xf] %v285_v23  ;;  %v289_v25 = vld [vmem:[%s1428_s18 + $0x48] sm:$0xf] }
  0x44   : > { %288 = vst [vmem:[%s250_s5 + $0x20] sm:$0xf] %v287_v24  ;;  %v291_v26 = vld [vmem:[%s1428_s18 + $0x50] sm:$0xf]  ;;  %v293_v27 = vld [vmem:[%s1428_s18 + $0x58] sm:$0xf] }
  0x45   : > { %290 = vst [vmem:[%s250_s5 + $0x24] sm:$0xf] %v289_v25  ;;  %292 = vst [vmem:[%s250_s5 + $0x28] sm:$0xf] %v291_v26  ;;  %v295_v28 = vld [vmem:[%s1428_s18 + $0x60] sm:$0xf] }
  0x46   : > { %294 = vst [vmem:[%s250_s5 + $0x2c] sm:$0xf] %v293_v27  ;;  %v297_v29 = vld [vmem:[%s1428_s18 + $0x68] sm:$0xf]  ;;  %v299_v30 = vld [vmem:[%s1428_s18 + $0x70] sm:$0xf] }
  0x47   : > { %296 = vst [vmem:[%s250_s5 + $0x30] sm:$0xf] %v295_v28  ;;  %298 = vst [vmem:[%s250_s5 + $0x34] sm:$0xf] %v297_v29  ;;  %v301_v31 = vld [vmem:[%s1428_s18 + $0x78] sm:$0xf] }
  0x48   : > { %300 = vst [vmem:[%s250_s5 + $0x38] sm:$0xf] %v299_v30  ;;  %302 = vst [vmem:[%s250_s5 + $0x3c] sm:$0xf] %v301_v31 }
  0x49 PF: > { %p865_p4 = scmp.ge.s32.totalorder %s1241_s22, 1  ;;  %p356_p5 = scmp.lt.s32.totalorder %s1241_s22, 9 }
  0x4b   : > { %p357_p6 = pnand %p865_p4, %p356_p5 }
  0x4c   : > { %s363_s4 = sand.u32 (!%p357_p6), 1, %s1209_s14   ;;  %s370_s3 = sand.u32 (!%p357_p6), 1, %s1201_s12  }
  0x4d   : > { %360 = sbr.rel (%p357_p6) target bundleno = 392 (0x188), region = 102  ;;  %s866_s7 = sshll.u32 (!%p357_p6), %s363_s4, 6 }
  0x4e   : > { %s867_s23 = sshll.u32 (!%p357_p6), %s370_s3, 6  ;;  %s392_s24 = sand.u32 (!%p357_p6), 1, %s1193_s10  }
  0x4f   : > { %s868_s25 = sshll.u32 (!%p357_p6), %s392_s24, 7  ;;  %s1453_s26 = scalar_lea.vmem (!%p357_p6), [#allocation3], %s866_s7 }
  0x50   : > { %s1455_s28 = scalar_lea.vmem (!%p357_p6), [#allocation4], %s867_s23  ;;  %s1457_s29 = scalar_lea.vmem (!%p357_p6), [#allocation5], %s868_s25 }
  0x51   : > { %p869_p7 = scmp.ne.s32.totalorder (!%p357_p6), %s1217_s16, 0 }
  0x54   : > { %402 = sbr.rel (%p869_p7) target bundleno = 93 (0x5d), region = 114  ;;  %v1243_v32 = vmov (!%p869_p7), 0.0  }
  0x55   : > { %403 = vst [vmem:[#allocation2] sm:$0xff] (!%p869_p7), %v1243_v32  ;;  %404 = vst [vmem:[#allocation2 + $0x8] sm:$0xff] (!%p869_p7), %v1243_v32 }
  0x56   : > { %405 = vst [vmem:[#allocation2 + $0x10] sm:$0xff] (!%p869_p7), %v1243_v32  ;;  %406 = vst [vmem:[#allocation2 + $0x18] sm:$0xff] (!%p869_p7), %v1243_v32 }
  0x57   : > { %407 = vst [vmem:[#allocation2 + $0x20] sm:$0xff] (!%p869_p7), %v1243_v32  ;;  %408 = vst [vmem:[#allocation2 + $0x28] sm:$0xff] (!%p869_p7), %v1243_v32 }
  0x58   : > { %409 = vst [vmem:[#allocation2 + $0x30] sm:$0xff] (!%p869_p7), %v1243_v32  ;;  %410 = vst [vmem:[#allocation2 + $0x38] sm:$0xff] (!%p869_p7), %v1243_v32 }
  0x59   : > { %411 = vst [vmem:[#allocation2 + $0x40] sm:$0xff] (!%p869_p7), %v1243_v32  ;;  %412 = vst [vmem:[#allocation2 + $0x48] sm:$0xff] (!%p869_p7), %v1243_v32 }
  0x5a   : > { %413 = vst [vmem:[#allocation2 + $0x50] sm:$0xff] (!%p869_p7), %v1243_v32  ;;  %414 = vst [vmem:[#allocation2 + $0x58] sm:$0xff] (!%p869_p7), %v1243_v32 }
  0x5b   : > { %415 = vst [vmem:[#allocation2 + $0x60] sm:$0xff] %v1243_v32  ;;  %416 = vst [vmem:[#allocation2 + $0x68] sm:$0xff] %v1243_v32 }
  0x5c   : > { %417 = vst [vmem:[#allocation2 + $0x70] sm:$0xff] %v1243_v32  ;;  %418 = vst [vmem:[#allocation2 + $0x78] sm:$0xff] %v1243_v32 }
  0x5d PF: > { %v1083_v33 = vld [vmem:[%s1455_s28] sm:$0xff]   ;;  %v1084_v34 = vld [vmem:[%s1455_s28 + $0x8] sm:$0xff]   ;;  %v1085_v35 = vld [vmem:[%s1455_s28 + $0x10] sm:$0xff]   ;;  %p886_p8 = scmp.ne.s32.totalorder %s1217_s16, 1 }
  0x5e   : > { %912 = vmatprep.subr.bf16.mxu0 %v1083_v33  ;;  %944 = vmatprep.subr.bf16.mxu1 %v1083_v33  ;;  %v1086_v36 = vld [vmem:[%s1455_s28 + $0x18] sm:$0xff]   ;;  %v1091_v37 = vld [vmem:[%s1453_s26] sm:$0xff]   ;;  %v1088_v40 = vld [vmem:[%s1455_s28 + $0x28] sm:$0xff]  }
  0x5f   : > { %913 = vmatpush3.bf16.msra.mxu0 %v1083_v33  ;;  %952 = vmatpush3.bf16.msra.mxu1 %v1083_v33  ;;  %v1092_v38 = vld [vmem:[%s1453_s26 + $0x20] sm:$0xff]   ;;  %v1089_v41 = vld [vmem:[%s1455_s28 + $0x30] sm:$0xff]   ;;  %v1090_v42 = vld [vmem:[%s1455_s28 + $0x38] sm:$0xff]  }
  0x60   : > { %914 = vmatprep.subr.bf16.mxu0 %v1084_v34  ;;  %945 = vmatprep.subr.bf16.mxu1 %v1084_v34  ;;  %v1087_v39 = vld [vmem:[%s1455_s28 + $0x20] sm:$0xff]   ;;  %v1093_v43 = vld [vmem:[%s1453_s26 + $0x8] sm:$0xff]   ;;  %v1095_v45 = vld [vmem:[%s1453_s26 + $0x10] sm:$0xff]  }
  0x61   : > { %928 = vmatprep.mubr.bf16.mxu0 %v1091_v37  ;;  %936 = vmatprep.mubr.bf16.mxu1 %v1092_v38  ;;  %v1094_v44 = vld [vmem:[%s1453_s26 + $0x28] sm:$0xff]   ;;  %v1096_v46 = vld [vmem:[%s1453_s26 + $0x30] sm:$0xff]   ;;  %v1097_v47 = vld [vmem:[%s1453_s26 + $0x18] sm:$0xff]  }
  0x62   : > { %v1098_v48 = vld [vmem:[%s1453_s26 + $0x38] sm:$0xff]   ;;  %v421_v49 = vld [vmem:[#allocation2 + $0x10] sm:$0xff]  ;;  %v419_v51 = vld [vmem:[#allocation2] sm:$0xff] }
  0x63   : > { %915 = vmatpush3.bf16.msra.mxu0 %v1084_v34  ;;  %953 = vmatpush3.bf16.msra.mxu1 %v1084_v34  ;;  %v429_v50 = vld [vmem:[#allocation2 + $0x50] sm:$0xff]  ;;  %v427_v52 = vld [vmem:[#allocation2 + $0x40] sm:$0xff]  ;;  %v422_v55 = vld [vmem:[#allocation2 + $0x18] sm:$0xff] }
  0x64   : > { %916 = vmatprep.subr.bf16.mxu0 %v1085_v35  ;;  %946 = vmatprep.subr.bf16.mxu1 %v1085_v35  ;;  %v430_v56 = vld [vmem:[#allocation2 + $0x58] sm:$0xff]  ;;  %v420_v61 = vld [vmem:[#allocation2 + $0x8] sm:$0xff]  ;;  %v425_v9 = vld [vmem:[#allocation2 + $0x30] sm:$0xff] }
  0x65   : > { %v428_v62 = vld [vmem:[#allocation2 + $0x48] sm:$0xff]  ;;  %v433_v10 = vld [vmem:[#allocation2 + $0x70] sm:$0xff]  ;;  %v423_v11 = vld [vmem:[#allocation2 + $0x20] sm:$0xff] }
  0x66   : > { %v431_v12 = vld [vmem:[#allocation2 + $0x60] sm:$0xff]  ;;  %v426_v15 = vld [vmem:[#allocation2 + $0x38] sm:$0xff]  ;;  %v424_v21 = vld [vmem:[#allocation2 + $0x28] sm:$0xff] }
  0x67   : > { %917 = vmatpush3.bf16.msra.mxu0 %v1085_v35  ;;  %954 = vmatpush3.bf16.msra.mxu1 %v1085_v35  ;;  %v434_v16 = vld [vmem:[#allocation2 + $0x78] sm:$0xff]  ;;  %v432_v22 = vld [vmem:[#allocation2 + $0x68] sm:$0xff] }
  0x68   : > { %918 = vmatprep.subr.bf16.mxu0 %v1086_v36  ;;  %947 = vmatprep.subr.bf16.mxu1 %v1086_v36 }
  0x6b   : > { %919 = vmatpush3.bf16.msra.mxu0 %v1086_v36  ;;  %955 = vmatpush3.bf16.msra.mxu1 %v1086_v36 }
  0x6c   : > { %920 = vmatprep.subr.bf16.mxu0 %v1087_v39  ;;  %948 = vmatprep.subr.bf16.mxu1 %v1087_v39 }
  0x6f   : > { %921 = vmatpush3.bf16.msra.mxu0 %v1087_v39  ;;  %956 = vmatpush3.bf16.msra.mxu1 %v1087_v39 }
  0x70   : > { %922 = vmatprep.subr.bf16.mxu0 %v1088_v40  ;;  %949 = vmatprep.subr.bf16.mxu1 %v1088_v40 }
  0x73   : > { %923 = vmatpush3.bf16.msra.mxu0 %v1088_v40  ;;  %957 = vmatpush3.bf16.msra.mxu1 %v1088_v40 }
  0x74   : > { %924 = vmatprep.subr.bf16.mxu0 %v1089_v41  ;;  %950 = vmatprep.subr.bf16.mxu1 %v1089_v41 }
  0x77   : > { %925 = vmatpush3.bf16.msra.mxu0 %v1089_v41  ;;  %958 = vmatpush3.bf16.msra.mxu1 %v1089_v41 }
  0x78   : > { %926 = vmatprep.subr.bf16.mxu0 %v1090_v42  ;;  %951 = vmatprep.subr.bf16.mxu1 %v1090_v42 }
  0x7b   : > { %927 = vmatpush3.bf16.msra.mxu0 %v1090_v42  ;;  %959 = vmatpush3.bf16.msra.mxu1 %v1090_v42 }
  0x7e   : > { %929 = vmatmul.mubr.bf16.vlgmr.msra.gmra.mrb[0].mxu0 %v1093_v43  ;;  %937 = vmatmul.mubr.bf16.vlgmr.msra.gmra.mrb[0].mxu1 %v1094_v44 }
  0x7f   : > { %932 = vmatprep.mubr.bf16.mxu0 %v1095_v45  ;;  %940 = vmatprep.mubr.bf16.mxu1 %v1096_v46 }
  0x86   : > { %933 = vmatmul.mubr.bf16.gmra.mrb[4].mxu0 %v1097_v47  ;;  %941 = vmatmul.mubr.bf16.gmra.mrb[4].mxu1 %v1098_v48 }
 0x151   : > { %v930_v53 = vpop.f32.mrb[0].mxu0  ;;  %v938_v54 = vpop.f32.mrb[0].mxu1 }
 0x152   : > { %v662_v57 = vadd.f32 %v930_v53, %v421_v49  ;;  %v670_v58 = vadd.f32 %v938_v54, %v429_v50  ;;  %v597_v59 = vpop.f32.mrb[1].mxu0  ;;  %v629_v60 = vpop.f32.mrb[1].mxu1 }
 0x153   : > { %v660_v63 = vadd.f32 %v597_v59, %v419_v51  ;;  %v668_v0 = vadd.f32 %v629_v60, %v427_v52  ;;  %v931_v1 = vpop.f32.mrb[2].mxu0  ;;  %v939_v2 = vpop.f32.mrb[2].mxu1 }
 0x154   : > { %678 = vst [vmem:[#allocation2 + $0x10] sm:$0xff] %v662_v57  ;;  %686 = vst [vmem:[#allocation2 + $0x50] sm:$0xff] %v670_v58  ;;  %v663_v3 = vadd.f32 %v931_v1, %v422_v55  ;;  %v671_v4 = vadd.f32 %v939_v2, %v430_v56  ;;  %v600_v5 = vpop.f32.mrb[3].mxu0  ;;  %v632_v6 = vpop.f32.mrb[3].mxu1 }
 0x155   : > { %676 = vst [vmem:[#allocation2] sm:$0xff] %v660_v63  ;;  %684 = vst [vmem:[#allocation2 + $0x40] sm:$0xff] %v668_v0  ;;  %v661_v7 = vadd.f32 %v600_v5, %v420_v61  ;;  %v669_v8 = vadd.f32 %v632_v6, %v428_v62 }
 0x156   : > { %679 = vst [vmem:[#allocation2 + $0x18] sm:$0xff] %v663_v3  ;;  %687 = vst [vmem:[#allocation2 + $0x58] sm:$0xff] %v671_v4 }
 0x157   : > { %677 = vst [vmem:[#allocation2 + $0x8] sm:$0xff] %v661_v7  ;;  %685 = vst [vmem:[#allocation2 + $0x48] sm:$0xff] %v669_v8 }
 0x159   : > { %v934_v13 = vpop.f32.mrb[4].mxu0  ;;  %v942_v14 = vpop.f32.mrb[4].mxu1  ;;  %695 = sbr.rel (%p886_p8) target bundleno = 361 (0x169), region = 118 }
 0x15a   : > { %v666_v17 = vadd.f32 %v934_v13, %v425_v9  ;;  %v674_v18 = vadd.f32 %v942_v14, %v433_v10  ;;  %v613_v19 = vpop.f32.mrb[5].mxu0  ;;  %v645_v20 = vpop.f32.mrb[5].mxu1 }
 0x15b   : > { %v664_v23 = vadd.f32 %v613_v19, %v423_v11  ;;  %v672_v24 = vadd.f32 %v645_v20, %v431_v12  ;;  %v935_v25 = vpop.f32.mrb[6].mxu0  ;;  %v943_v26 = vpop.f32.mrb[6].mxu1  ;;  %v698_v35 = vld [vmem:[#allocation2 + $0x10] sm:$0xff] (!%p886_p8) }
 0x15c   : > { %682 = vst [vmem:[#allocation2 + $0x30] sm:$0xff] %v666_v17  ;;  %690 = vst [vmem:[#allocation2 + $0x70] sm:$0xff] %v674_v18  ;;  %v667_v27 = vadd.f32 %v935_v25, %v426_v15  ;;  %v675_v28 = vadd.f32 %v943_v26, %v434_v16  ;;  %v616_v29 = vpop.f32.mrb[7].mxu0  ;;  %v648_v30 = vpop.f32.mrb[7].mxu1  ;;  %v696_v33 = vld [vmem:[#allocation2] sm:$0xff] (!%p886_p8)  ;;  %v706_v43 = vld [vmem:[#allocation2 + $0x50] sm:$0xff] (!%p886_p8) }
 0x15d   : > { %680 = vst [vmem:[#allocation2 + $0x20] sm:$0xff] %v664_v23  ;;  %688 = vst [vmem:[#allocation2 + $0x60] sm:$0xff] %v672_v24  ;;  %v665_v31 = vadd.f32 %v616_v29, %v424_v21  ;;  %v673_v32 = vadd.f32 %v648_v30, %v432_v22  ;;  %v699_v36 = vld [vmem:[#allocation2 + $0x18] sm:$0xff] (!%p886_p8)  ;;  %v704_v41 = vld [vmem:[#allocation2 + $0x40] sm:$0xff] (!%p886_p8) }
 0x15e   : > { %683 = vst [vmem:[#allocation2 + $0x38] sm:$0xff] %v667_v27  ;;  %691 = vst [vmem:[#allocation2 + $0x78] sm:$0xff] %v675_v28  ;;  %v697_v34 = vld [vmem:[#allocation2 + $0x8] sm:$0xff] (!%p886_p8)  ;;  %v707_v44 = vld [vmem:[#allocation2 + $0x58] sm:$0xff] (!%p886_p8) }
 0x15f   : > { %681 = vst [vmem:[#allocation2 + $0x28] sm:$0xff] %v665_v31  ;;  %689 = vst [vmem:[#allocation2 + $0x68] sm:$0xff] %v673_v32  ;;  %v705_v42 = vld [vmem:[#allocation2 + $0x48] sm:$0xff] (!%p886_p8) }
 0x160   : > { %712 = vst [vmem:[%s1457_s29] sm:$0xff] %v696_v33  ;;  %713 = vst [vmem:[%s1457_s29 + $0x8] sm:$0xff] %v697_v34 }
 0x161   : > { %714 = vst [vmem:[%s1457_s29 + $0x10] sm:$0xff] %v698_v35  ;;  %715 = vst [vmem:[%s1457_s29 + $0x18] sm:$0xff] %v699_v36 }
 0x162   : > { %720 = vst [vmem:[%s1457_s29 + $0x40] sm:$0xff] %v704_v41  ;;  %721 = vst [vmem:[%s1457_s29 + $0x48] sm:$0xff] %v705_v42 }
 0x163   : > { %v702_v39 = vld [vmem:[#allocation2 + $0x30] sm:$0xff]  ;;  %722 = vst [vmem:[%s1457_s29 + $0x50] sm:$0xff] %v706_v43  ;;  %723 = vst [vmem:[%s1457_s29 + $0x58] sm:$0xff] %v707_v44 }
 0x164   : > { %v700_v37 = vld [vmem:[#allocation2 + $0x20] sm:$0xff]  ;;  %718 = vst [vmem:[%s1457_s29 + $0x30] sm:$0xff] %v702_v39  ;;  %v710_v47 = vld [vmem:[#allocation2 + $0x70] sm:$0xff] }
 0x165   : > { %716 = vst [vmem:[%s1457_s29 + $0x20] sm:$0xff] %v700_v37  ;;  %v703_v40 = vld [vmem:[#allocation2 + $0x38] sm:$0xff]  ;;  %v708_v45 = vld [vmem:[#allocation2 + $0x60] sm:$0xff]  ;;  %726 = vst [vmem:[%s1457_s29 + $0x70] sm:$0xff] %v710_v47 }
 0x166   : > { %v701_v38 = vld [vmem:[#allocation2 + $0x28] sm:$0xff]  ;;  %719 = vst [vmem:[%s1457_s29 + $0x38] sm:$0xff] %v703_v40  ;;  %724 = vst [vmem:[%s1457_s29 + $0x60] sm:$0xff] %v708_v45  ;;  %v711_v48 = vld [vmem:[#allocation2 + $0x78] sm:$0xff] }
 0x167   : > { %717 = vst [vmem:[%s1457_s29 + $0x28] sm:$0xff] %v701_v38  ;;  %v709_v46 = vld [vmem:[#allocation2 + $0x68] sm:$0xff]  ;;  %727 = vst [vmem:[%s1457_s29 + $0x78] sm:$0xff] %v711_v48 }
 0x168   : > { %725 = vst [vmem:[%s1457_s29 + $0x68] sm:$0xff] %v709_v46 }
 0x169 PF: > { %s1598_s12 = sld [smem:[#allocation9_spill]]  ;;  %s1599_s14 = sld [smem:[#allocation8_spill]] }
 0x16a   : > { %s744_s5 = sshll.u32 %s1457_s29, 4  ;;  %s1600_s23 = sld [smem:[#allocation12_spill]]  ;;  %s1496_s5 = int_to_ptr.vmem [resolvable:$true] %s744_s5 }
 0x16b   : > { %s1505_s26 = scalar_lea.sflag [#allocation6], %s392_s24  ;;  %s1099_s28 = scalar_lea.vmem %s1496_s5, 2048 }
 0x16c   : > { %p1100_p9 = scmp.ne.s32.totalorder %s1496_s5, %s1099_s28  ;;  %s1244_s29 = smov [#allocation5]  }
 0x16e   : > { %p1101_p10 = pnand %p1100_p9, %p1383_p0 }
 0x16f   : > { %s895_s16 = sshll.u32 %s1598_s12, 5  ;;  %s1103_s12 = sshll.u32 %s1244_s29, 4  ;;  %s1104_s12 = int_to_ptr.vmem [resolvable:$false] %s1103_s12 }
 0x170   : > { %s741_s18 = sadd.s32 %s1599_s14, %s895_s16  ;;  %p1102_p11 = pneg %p1101_p10 }
 0x171   : > { %s890_s4 = sshll.u32 %s741_s18, 7  ;;  %s1105_s14 = scalar_lea.vmem %s1104_s12, 4096 }
 0x172   : > { %s1501_s25 = scalar_lea.hbm %s1600_s23, %s890_s4  ;;  %p1106_p12 = scmp.lt.s32.totalorder %s1496_s5, %s1104_s12 }
 0x173   : > { %p1107_p13 = scmp.lt.s32.totalorder %s1105_s14, %s1099_s28 }
 0x175   : > { %p1108_p1 = por %p1107_p13, %p1106_p12 }
 0x177   : > { %p1109_p3 = pnand %p1108_p1, %p1102_p11 }
 0x179   : > { %1112 = shalt.err (!%p1109_p3)
}
 0x17a   : > { %s1113_s24 = scalar_lea.hbm %s1501_s25, 2048  ;;  %s1117_s4 = scalar_lea.hbm %s1600_s23, 8192 }
 0x17b   : > { %p1114_p4 = scmp.ne.s32.totalorder %s1501_s25, %s1113_s24  ;;  %p1118_p7 = scmp.lt.u32.totalorder %s1501_s25, %s1600_s23 }
 0x17c   : > { %p1119_p8 = scmp.lt.u32.totalorder %s1117_s4, %s1113_s24  ;;  %p1121_p10 = scmp.lt.u32.totalorder %s1113_s24, %s1501_s25 }
 0x17d   : > { %p1115_p5 = pnand %p1114_p4, %p1383_p0 }
 0x17e   : > { %p1120_p9 = por %p1119_p8, %p1118_p7 }
 0x17f   : > { %p1116_p6 = pneg %p1115_p5 }
 0x180   : > { %p1122_p11 = por %p1121_p10, %p1120_p9 }
 0x182   : > { %p1123_p12 = pnand %p1122_p11, %p1116_p6 }
 0x184   : > { %1126 = shalt.err (!%p1123_p12)
}
 0x185   : > { %s1245_s28 = smov 128   ;;  %s1246_s29 = smov 256  }
 0x186   : > { %s1247_s12 = smov 8  }
 0x187   : > { %960 = dma.vmem_to_hbm [thread:$0]  (%p1383_p0), %s1496_s5, 2048, %s1501_s25, %s1505_s26, %s1245_s28, %s1246_s29, %s1247_s12  }
 0x188 PF: > { %p966_p13 = scmp.ge.s32.totalorder %s1241_s22, 2  ;;  %s759_s14 = sand.u32 1, %s1189_s9  }
 0x189   : > { %s760_s24 = scalar_lea.sflag [#allocation6], %s759_s14 }
 0x18a   : > { %p963_p1 = pnand %p966_p13, %p1389_p2 }
 0x18c   : > { %1184 = dma.done.wait (!%p963_p1), %s760_s24, 2048  }
 0x18d   : > { %1186 = vsyncadd (!%p963_p1), %s760_s24, 4294965248  ;;  %s15_s22 = sadd.s32 1, %s1241_s22   ;;  %s1602_s6 = sld [smem:[#allocation10_spill]] }
 0x18e   : > { %p1534_p3 = scmp.ge.s32.totalorder %s15_s22, 10   ;;  %s1603_s30 = sld [smem:[#allocation11_spill]] }
 0x18f   : > { %s1605_s9 = smov %s1193_s10  ;;  %s1606_s10 = smov %s1197_s11 }
 0x190   : > { %s1607_s11 = smov %s1381_s17  ;;  %s1608_s12 = smov %s1205_s13 }
 0x191   : > { %s1609_s13 = smov %s1367_s8  ;;  %s1610_s14 = smov %s1213_s15 }
 0x192   : > { %s1611_s15 = smov %s1378_s2  ;;  %s1612_s16 = smov %s1229_s19 }
 0x193   : > { %s1613_s17 = smov %s1233_s20  ;;  %s1614_s18 = smov %s1237_s21 }
 0x194   : > { %s1615_s19 = smov %s1602_s6  ;;  %s1616_s20 = smov %s1603_s30 }
 0x195   : > { %s1617_s21 = smov %s1627_s27  ;;  %14 = sbr.rel (!%p1534_p3) target bundleno = 10 (0xa), region = 166 }
 0x19c   :  { %765 = vsyncpa [#allocation6], 1 }
 0x19d   :  { %767 = vsyncpa [#allocation6 + $0x1], 1 }

</bundles_post_ra>
